<compile_context>
chip_gen: v7x
topology: tpu7x:2x2x1
jax: 0.10.0
libtpu: 0.0.40
codegen_flags: <defaults>
</compile_context>

<pallas_src>
import functools

import jax
import jax.numpy as jnp
from jax import lax
from jax.experimental import pallas as pl
from jax.experimental.pallas import tpu as pltpu


def _round_up(x, m):
    return ((x + m - 1) // m) * m


def _feedback_lstm_step_kernel(onehot0_ref, h0_ref, c0_ref,
                               gtbl_ref, whh_ref, wdec_ref, bdec_ref,
                               out_ref, hout_ref, cout_ref,
                               x1h_ref, hlo_ref,
                               *, nhid_p, ntok_p, mxu_dtype):
    """One feedback step per grid index t (sequential 'arbitrary' axis)."""
    t = pl.program_id(0)

    # Grid step 0: seed the carried state (VMEM-resident across the grid).
    @pl.when(t == 0)
    def _():
        x1h_ref[...] = onehot0_ref[...]
        cout_ref[...] = c0_ref[...]
        hlo_ref[...] = h0_ref[...].astype(mxu_dtype)

    c_prev = cout_ref[...]

    # --- LSTM gate preactivation (PyTorch gate order i, f, g, o) ---
    # Input side: one selection matmul against the bias-folded
    # (emb @ W_ih^T + b_ih + b_hh) table; kept f32 so the selected row is
    # (near) exact.  Hidden side: bf16 MXU with f32 accumulation.
    gates = jnp.dot(x1h_ref[...], gtbl_ref[...],
                    preferred_element_type=jnp.float32)
    gates = gates + jnp.dot(hlo_ref[...], whh_ref[...],
                            preferred_element_type=jnp.float32)

    i_g = jax.nn.sigmoid(gates[:, 0 * nhid_p:1 * nhid_p])
    f_g = jax.nn.sigmoid(gates[:, 1 * nhid_p:2 * nhid_p])
    g_g = jnp.tanh(gates[:, 2 * nhid_p:3 * nhid_p])
    o_g = jax.nn.sigmoid(gates[:, 3 * nhid_p:4 * nhid_p])
    c = f_g * c_prev + i_g * g_g
    h = o_g * jnp.tanh(c)
    h_lo = h.astype(mxu_dtype)   # cast once; reused for W_dec now, W_hh next step

    # --- decoder; padded vocab lanes carry a -1e30 bias (never the max) ---
    logits = jnp.dot(h_lo, wdec_ref[...],
                     preferred_element_type=jnp.float32) + bdec_ref[...]
    m = jnp.max(logits, axis=-1, keepdims=True)

    # --- feedback first (recurrence-critical): argmax -> next one-hot, state ---
    lane = lax.broadcasted_iota(jnp.int32, (1, ntok_p), 1)
    amax = jnp.min(jnp.where(logits == m, lane, ntok_p), axis=-1, keepdims=True)
    x1h_ref[...] = (lane == amax).astype(x1h_ref.dtype)   # first-occurrence tie-break
    cout_ref[...] = c
    hlo_ref[...] = h_lo
    hout_ref[...] = h

    # --- log-softmax epilogue (off the feedback chain); the streamed
    #     (1, bs_p, V_pad) tile's HBM writeback overlaps step t+1 ---
    lse = m + jnp.log(jnp.sum(jnp.exp(logits - m), axis=-1, keepdims=True))
    out_ref[0, :, :] = logits - lse


def feedback_model_forward(inp_ids, state_0, params, *, seq_len,
                           mxu_dtype=jnp.bfloat16):
    """Pallas equivalent of FeedbackModel.forward.

    inp_ids : (bs,) int32 token ids
    state_0 : (h0, c0), each (n_layers=1, bs, nhid) float32
    returns : out (seq_len*bs, ntoken) log-probs, (h_n, c_n) each (1, bs, nhid)
    """
    emb, wihT, whhT, bias, wdecT, bdec = params
    ntoken, _ = emb.shape
    nhid = whhT.shape[0]
    bs = inp_ids.shape[0]
    h0, c0 = state_0
    f32 = jnp.float32

    ntok_p = _round_up(ntoken, 128)
    nhid_p = _round_up(nhid, 128)
    bs_p = _round_up(bs, 16)          # dense bf16 LHS sublane packing

    def pad2(x, rows, cols, value=0.0):
        return jnp.pad(x.astype(f32),
                       ((0, rows - x.shape[0]), (0, cols - x.shape[1])),
                       constant_values=value)

    def pad_gates(w, rows_p):  # (rows, 4*nhid) -> (rows_p, 4*nhid_p), per-gate 128-aligned slots
        rows = w.shape[0]
        wg = w.astype(f32).reshape(rows, 4, nhid)
        wg = jnp.pad(wg, ((0, rows_p - rows), (0, 0), (0, nhid_p - nhid)))
        return wg.reshape(rows_p, 4 * nhid_p)

    # Precompute the bias-folded input-gate table: one row per vocab token.
    gate_tbl = jnp.dot(emb.astype(f32), wihT.astype(f32),
                       precision=lax.Precision.HIGHEST,
                       preferred_element_type=f32) + bias.astype(f32)
    gate_tbl_p = pad_gates(gate_tbl, ntok_p)                    # f32 (V_pad, 4*H_pad)
    whh_p = pad_gates(whhT, nhid_p).astype(mxu_dtype)           # bf16 (H_pad, 4*H_pad)
    wdec_p = pad2(wdecT, nhid_p, ntok_p).astype(mxu_dtype)      # bf16 (H_pad, V_pad)
    bdec_p = pad2(bdec, 1, ntok_p, value=-1e30)                 # mask padded vocab lanes

    onehot0 = jax.nn.one_hot(inp_ids, ntok_p, dtype=f32)
    onehot0 = jnp.pad(onehot0, ((0, bs_p - bs), (0, 0)))
    h0_p = pad2(h0[0], bs_p, nhid_p)
    c0_p = pad2(c0[0], bs_p, nhid_p)

    kernel = functools.partial(_feedback_lstm_step_kernel,
                               nhid_p=nhid_p, ntok_p=ntok_p, mxu_dtype=mxu_dtype)

    def whole(shape):   # full-array block, constant index -> no per-step re-DMA
        return pl.BlockSpec(shape, lambda t, _s=shape: (0,) * len(_s))

    grid_spec = pltpu.PrefetchScalarGridSpec(
        num_scalar_prefetch=0,
        grid=(seq_len,),
        in_specs=[
            whole((bs_p, ntok_p)),         # initial one-hot
            whole((bs_p, nhid_p)),         # h0
            whole((bs_p, nhid_p)),         # c0
            whole((ntok_p, 4 * nhid_p)),   # emb@W_ih^T + bias table (f32)
            whole((nhid_p, 4 * nhid_p)),   # W_hh^T (bf16)
            whole((nhid_p, ntok_p)),       # W_dec^T (bf16)
            whole((1, ntok_p)),            # b_dec row (f32, -1e30 on padded lanes)
        ],
        out_specs=(
            pl.BlockSpec((1, bs_p, ntok_p), lambda t: (t, 0, 0)),  # streamed log-probs
            whole((bs_p, nhid_p)),                                 # h_n (carried, flushed once)
            whole((bs_p, nhid_p)),                                 # c_n (carried, flushed once)
        ),
        scratch_shapes=[
            pltpu.VMEM((bs_p, ntok_p), f32),        # fed-back one-hot
            pltpu.VMEM((bs_p, nhid_p), mxu_dtype),  # h in MXU dtype (cast once per step)
        ],
    )

    outs, h_n, c_n = pl.pallas_call(
        kernel,
        grid_spec=grid_spec,
        out_shape=(
            jax.ShapeDtypeStruct((seq_len, bs_p, ntok_p), f32),
            jax.ShapeDtypeStruct((bs_p, nhid_p), f32),
            jax.ShapeDtypeStruct((bs_p, nhid_p), f32),
        ),
        compiler_params=pltpu.CompilerParams(
            dimension_semantics=("arbitrary",),      # strictly sequential recurrence
            # Keep all weights VMEM-resident; 48 MiB is above every default
            # scoped limit yet below the smallest physical VMEM (v7x 64 MiB).
            vmem_limit_bytes=48 * 1024 * 1024,
        ),
    )(onehot0, h0_p, c0_p, gate_tbl_p, whh_p, wdec_p, bdec_p)

    out = outs[:, :bs, :ntoken].reshape(seq_len * bs, ntoken)
    h_last = h_n[:bs, :nhid][None]
    c_last = c_n[:bs, :nhid][None]
    return out, (h_last, c_last)


def init_params(key, *, ntoken, ninp, nhid):
    """Deterministic synthetic parameters (PyTorch-like uniform init)."""
    ks = jax.random.split(key, 6)
    k_lstm = 1.0 / jnp.sqrt(nhid)
    emb = jax.random.uniform(ks[0], (ntoken, ninp), jnp.float32, -0.1, 0.1)
    wihT = jax.random.uniform(ks[1], (ninp, 4 * nhid), jnp.float32, -k_lstm, k_lstm)
    whhT = jax.random.uniform(ks[2], (nhid, 4 * nhid), jnp.float32, -k_lstm, k_lstm)
    bias = jax.random.uniform(ks[3], (1, 4 * nhid), jnp.float32, -k_lstm, k_lstm) * 2.0
    wdecT = jax.random.uniform(ks[4], (nhid, ntoken), jnp.float32, -0.1, 0.1)
    bdec = jnp.zeros((1, ntoken), jnp.float32)
    return emb, wihT, whhT, bias, wdecT, bdec


if __name__ == "__main__":
    # Small shapes consistent with the module (hidden/seq scaled down).
    bs = 20          # matches module
    ntoken = 10      # embed_size (vocab), matches module
    ninp = 16        # embedding dim (small)
    nhid = 32        # hidden_size (scaled down)
    n_layers = 1
    seq_len = 8      # scaled down

    key = jax.random.PRNGKey(0)
    k_inp, k_par = jax.random.split(key)

    inp = jax.random.randint(k_inp, (bs,), 0, ntoken, dtype=jnp.int32)
    state_0 = (jnp.ones((n_layers, bs, nhid), jnp.float32),
               jnp.ones((n_layers, bs, nhid), jnp.float32))
    params = init_params(k_par, ntoken=ntoken, ninp=ninp, nhid=nhid)

    out, (h_n, c_n) = feedback_model_forward(inp, state_0, params, seq_len=seq_len)
    jax.block_until_ready((out, h_n, c_n))

    assert out.shape == (seq_len * bs, ntoken)
    assert h_n.shape == (n_layers, bs, nhid) and c_n.shape == (n_layers, bs, nhid)
    assert bool(jnp.all(jnp.isfinite(out)))
    # log_softmax rows must (exp-)sum to 1 over the real vocab
    assert bool(jnp.allclose(jnp.sum(jnp.exp(out), axis=-1), 1.0, atol=1e-5))
    print("KERNEL_OK")
</pallas_src>

<mosaic_0001>
module attributes {stable_mosaic.version = 11 : i64} {
  func.func @_feedback_lstm_step_kernel(%arg0: i32, %arg1: memref<32x128xf32, #tpu.memory_space<vmem>>, %arg2: memref<32x128xf32, #tpu.memory_space<vmem>>, %arg3: memref<32x128xf32, #tpu.memory_space<vmem>>, %arg4: memref<128x512xf32, #tpu.memory_space<vmem>>, %arg5: memref<128x512xbf16, #tpu.memory_space<vmem>>, %arg6: memref<128x128xbf16, #tpu.memory_space<vmem>>, %arg7: memref<1x128xf32, #tpu.memory_space<vmem>>, %arg8: memref<1x32x128xf32, #tpu.memory_space<vmem>>, %arg9: memref<32x128xf32, #tpu.memory_space<vmem>>, %arg10: memref<32x128xf32, #tpu.memory_space<vmem>>, %arg11: memref<32x128xf32, #tpu.memory_space<vmem>>, %arg12: memref<32x128xbf16, #tpu.memory_space<vmem>>) attributes {dimension_semantics = [#tpu.dimension_semantics<arbitrary>], iteration_bounds = array<i64: 8>, scalar_prefetch = 0 : i64, scratch_operands = 2 : i64, tpu.core_type = #tpu.core_type<tc>, window_params = [{pipeline_mode = #tpu.pipeline_mode<synchronous>, transform_indices = @transform_0, window_bounds = array<i64: 32, 128>}, {pipeline_mode = #tpu.pipeline_mode<synchronous>, transform_indices = @transform_1, window_bounds = array<i64: 32, 128>}, {pipeline_mode = #tpu.pipeline_mode<synchronous>, transform_indices = @transform_2, window_bounds = array<i64: 32, 128>}, {pipeline_mode = #tpu.pipeline_mode<synchronous>, transform_indices = @transform_3, window_bounds = array<i64: 128, 512>}, {pipeline_mode = #tpu.pipeline_mode<synchronous>, transform_indices = @transform_4, window_bounds = array<i64: 128, 512>}, {pipeline_mode = #tpu.pipeline_mode<synchronous>, transform_indices = @transform_5, window_bounds = array<i64: 128, 128>}, {pipeline_mode = #tpu.pipeline_mode<synchronous>, transform_indices = @transform_6, window_bounds = array<i64: 1, 128>}, {transform_indices = @transform_7, window_bounds = array<i64: 1, 32, 128>}, {pipeline_mode = #tpu.pipeline_mode<synchronous>, transform_indices = @transform_8, window_bounds = array<i64: 32, 128>}, {pipeline_mode = #tpu.pipeline_mode<synchronous>, transform_indices = @transform_9, window_bounds = array<i64: 32, 128>}]} {
    %c0_i32 = arith.constant 0 : i32
    %0 = arith.cmpi eq, %arg0, %c0_i32 : i32
    %1 = arith.extui %0 : i1 to i32
    %c0_i32_0 = arith.constant 0 : i32
    %2 = arith.cmpi ne, %1, %c0_i32_0 : i32
    scf.if %2 {
      %c0_33 = arith.constant 0 : index
      %c0_34 = arith.constant 0 : index
      %74 = vector.load %arg1[%c0_33, %c0_34] : memref<32x128xf32, #tpu.memory_space<vmem>>, vector<32x128xf32>
      %c0_35 = arith.constant 0 : index
      %c0_36 = arith.constant 0 : index
      %75 = vector.load %arg11[%c0_35, %c0_36] : memref<32x128xf32, #tpu.memory_space<vmem>>, vector<32x128xf32>
      tpu.vector_store %arg11[%c0_35, %c0_36], %74 {strides = array<i32>} : memref<32x128xf32, #tpu.memory_space<vmem>>, vector<32x128xf32>,
      %c0_37 = arith.constant 0 : index
      %c0_38 = arith.constant 0 : index
      %76 = vector.load %arg3[%c0_37, %c0_38] : memref<32x128xf32, #tpu.memory_space<vmem>>, vector<32x128xf32>
      %c0_39 = arith.constant 0 : index
      %c0_40 = arith.constant 0 : index
      %77 = vector.load %arg10[%c0_39, %c0_40] : memref<32x128xf32, #tpu.memory_space<vmem>>, vector<32x128xf32>
      tpu.vector_store %arg10[%c0_39, %c0_40], %76 {strides = array<i32>} : memref<32x128xf32, #tpu.memory_space<vmem>>, vector<32x128xf32>,
      %c0_41 = arith.constant 0 : index
      %c0_42 = arith.constant 0 : index
      %78 = vector.load %arg2[%c0_41, %c0_42] : memref<32x128xf32, #tpu.memory_space<vmem>>, vector<32x128xf32>
      %79 = arith.truncf %78 : vector<32x128xf32> to vector<32x128xbf16>
      %c0_43 = arith.constant 0 : index
      %c0_44 = arith.constant 0 : index
      %80 = vector.load %arg12[%c0_43, %c0_44] : memref<32x128xbf16, #tpu.memory_space<vmem>>, vector<32x128xbf16>
      tpu.vector_store %arg12[%c0_43, %c0_44], %79 {strides = array<i32>} : memref<32x128xbf16, #tpu.memory_space<vmem>>, vector<32x128xbf16>,
    } else {
    }
    %c0 = arith.constant 0 : index
    %c0_1 = arith.constant 0 : index
    %3 = vector.load %arg10[%c0, %c0_1] : memref<32x128xf32, #tpu.memory_space<vmem>>, vector<32x128xf32>
    %c0_2 = arith.constant 0 : index
    %c0_3 = arith.constant 0 : index
    %4 = vector.load %arg11[%c0_2, %c0_3] : memref<32x128xf32, #tpu.memory_space<vmem>>, vector<32x128xf32>
    %c0_4 = arith.constant 0 : index
    %c0_5 = arith.constant 0 : index
    %5 = vector.load %arg4[%c0_4, %c0_5] : memref<128x512xf32, #tpu.memory_space<vmem>>, vector<128x512xf32>
    %cst = arith.constant dense<0.000000e+00> : vector<32x512xf32>
    %6 = tpu.matmul %4, %5, %cst {dimension_numbers = #tpu.dot_dimension_numbers<[1], [0], [0], [1], [0, 0, 1, 1], [], []>} : vector<32x128xf32>, vector<128x512xf32>, vector<32x512xf32> -> vector<32x512xf32>
    %c0_6 = arith.constant 0 : index
    %c0_7 = arith.constant 0 : index
    %7 = vector.load %arg12[%c0_6, %c0_7] : memref<32x128xbf16, #tpu.memory_space<vmem>>, vector<32x128xbf16>
    %c0_8 = arith.constant 0 : index
    %c0_9 = arith.constant 0 : index
    %8 = vector.load %arg5[%c0_8, %c0_9] : memref<128x512xbf16, #tpu.memory_space<vmem>>, vector<128x512xbf16>
    %cst_10 = arith.constant dense<0.000000e+00> : vector<32x512xf32>
    %9 = tpu.matmul %7, %8, %cst_10 {dimension_numbers = #tpu.dot_dimension_numbers<[1], [0], [0], [1], [0, 0, 1, 1], [], []>} : vector<32x128xbf16>, vector<128x512xbf16>, vector<32x512xf32> -> vector<32x512xf32>
    %10 = arith.addf %6, %9 : vector<32x512xf32>
    %11 = vector.extract_strided_slice %10 {offsets = [0, 0], sizes = [32, 128], strides = [1, 1]} : vector<32x512xf32> to vector<32x128xf32>
    %12 = arith.negf %11 : vector<32x128xf32>
    %13 = math.exp %12 : vector<32x128xf32>
    %cst_11 = arith.constant 1.000000e+00 : f32
    %14 = vector.broadcast %cst_11 : f32 to vector<32x128xf32>
    %15 = arith.addf %14, %13 : vector<32x128xf32>
    %16 = arith.divf %14, %15 : vector<32x128xf32>
    %17 = vector.extract_strided_slice %10 {offsets = [0, 128], sizes = [32, 128], strides = [1, 1]} : vector<32x512xf32> to vector<32x128xf32>
    %18 = arith.negf %17 : vector<32x128xf32>
    %19 = math.exp %18 : vector<32x128xf32>
    %cst_12 = arith.constant 1.000000e+00 : f32
    %20 = vector.broadcast %cst_12 : f32 to vector<32x128xf32>
    %21 = arith.addf %20, %19 : vector<32x128xf32>
    %22 = arith.divf %20, %21 : vector<32x128xf32>
    %23 = vector.extract_strided_slice %10 {offsets = [0, 256], sizes = [32, 128], strides = [1, 1]} : vector<32x512xf32> to vector<32x128xf32>
    %24 = math.tanh %23 : vector<32x128xf32>
    %25 = vector.extract_strided_slice %10 {offsets = [0, 384], sizes = [32, 128], strides = [1, 1]} : vector<32x512xf32> to vector<32x128xf32>
    %26 = arith.negf %25 : vector<32x128xf32>
    %27 = math.exp %26 : vector<32x128xf32>
    %cst_13 = arith.constant 1.000000e+00 : f32
    %28 = vector.broadcast %cst_13 : f32 to vector<32x128xf32>
    %29 = arith.addf %28, %27 : vector<32x128xf32>
    %30 = arith.divf %28, %29 : vector<32x128xf32>
    %31 = arith.mulf %22, %3 : vector<32x128xf32>
    %32 = arith.mulf %16, %24 : vector<32x128xf32>
    %33 = arith.addf %31, %32 : vector<32x128xf32>
    %34 = math.tanh %33 : vector<32x128xf32>
    %35 = arith.mulf %30, %34 : vector<32x128xf32>
    %36 = arith.truncf %35 : vector<32x128xf32> to vector<32x128xbf16>
    %c0_14 = arith.constant 0 : index
    %c0_15 = arith.constant 0 : index
    %37 = vector.load %arg6[%c0_14, %c0_15] : memref<128x128xbf16, #tpu.memory_space<vmem>>, vector<128x128xbf16>
    %cst_16 = arith.constant dense<0.000000e+00> : vector<32x128xf32>
    %38 = tpu.matmul %36, %37, %cst_16 {dimension_numbers = #tpu.dot_dimension_numbers<[1], [0], [0], [1], [0, 0, 1, 1], [], []>} : vector<32x128xbf16>, vector<128x128xbf16>, vector<32x128xf32> -> vector<32x128xf32>
    %c0_17 = arith.constant 0 : index
    %c0_18 = arith.constant 0 : index
    %39 = vector.load %arg7[%c0_17, %c0_18] : memref<1x128xf32, #tpu.memory_space<vmem>>, vector<1x128xf32>
    %40 = vector.broadcast %39 : vector<1x128xf32> to vector<32x128xf32>
    %41 = arith.addf %38, %40 : vector<32x128xf32>
    %cst_19 = arith.constant dense<0xFF800000> : vector<32xf32>
    %42 = vector.multi_reduction <maximumf>, %41, %cst_19 [1] : vector<32x128xf32> to vector<32xf32>
    %43 = vector.shape_cast %42 : vector<32xf32> to vector<32x1xf32>
    %44 = tpu.iota {dimensions = array<i32: 1>} : vector<1x128xi32>
    %45 = vector.broadcast %43 : vector<32x1xf32> to vector<32x128xf32>
    %46 = arith.cmpf oeq, %41, %45 : vector<32x128xf32>
    %c128_i32 = arith.constant 128 : i32
    %47 = vector.shape_cast %44 : vector<1x128xi32> to vector<1x128xi32>
    %48 = vector.broadcast %47 : vector<1x128xi32> to vector<32x128xi32>
    %49 = vector.broadcast %c128_i32 : i32 to vector<32x128xi32>
    %50 = arith.select %46, %48, %49 : vector<32x128xi1>, vector<32x128xi32>
    %cst_20 = arith.constant dense<2147483647> : vector<32xi32>
    %51 = vector.multi_reduction <minsi>, %50, %cst_20 [1] : vector<32x128xi32> to vector<32xi32>
    %52 = vector.shape_cast %51 : vector<32xi32> to vector<32x1xi32>
    %53 = vector.broadcast %44 : vector<1x128xi32> to vector<32x128xi32>
    %54 = vector.broadcast %52 : vector<32x1xi32> to vector<32x128xi32>
    %55 = arith.cmpi eq, %53, %54 : vector<32x128xi32>
    %56 = arith.extui %55 : vector<32x128xi1> to vector<32x128xi32>
    %57 = arith.sitofp %56 : vector<32x128xi32> to vector<32x128xf32>
    %c0_21 = arith.constant 0 : index
    %c0_22 = arith.constant 0 : index
    %58 = vector.load %arg11[%c0_21, %c0_22] : memref<32x128xf32, #tpu.memory_space<vmem>>, vector<32x128xf32>
    tpu.vector_store %arg11[%c0_21, %c0_22], %57 {strides = array<i32>} : memref<32x128xf32, #tpu.memory_space<vmem>>, vector<32x128xf32>,
    %c0_23 = arith.constant 0 : index
    %c0_24 = arith.constant 0 : index
    %59 = vector.load %arg10[%c0_23, %c0_24] : memref<32x128xf32, #tpu.memory_space<vmem>>, vector<32x128xf32>
    tpu.vector_store %arg10[%c0_23, %c0_24], %33 {strides = array<i32>} : memref<32x128xf32, #tpu.memory_space<vmem>>, vector<32x128xf32>,
    %c0_25 = arith.constant 0 : index
    %c0_26 = arith.constant 0 : index
    %60 = vector.load %arg12[%c0_25, %c0_26] : memref<32x128xbf16, #tpu.memory_space<vmem>>, vector<32x128xbf16>
    tpu.vector_store %arg12[%c0_25, %c0_26], %36 {strides = array<i32>} : memref<32x128xbf16, #tpu.memory_space<vmem>>, vector<32x128xbf16>,
    %c0_27 = arith.constant 0 : index
    %c0_28 = arith.constant 0 : index
    %61 = vector.load %arg9[%c0_27, %c0_28] : memref<32x128xf32, #tpu.memory_space<vmem>>, vector<32x128xf32>
    tpu.vector_store %arg9[%c0_27, %c0_28], %35 {strides = array<i32>} : memref<32x128xf32, #tpu.memory_space<vmem>>, vector<32x128xf32>,
    %62 = vector.broadcast %43 : vector<32x1xf32> to vector<32x128xf32>
    %63 = arith.subf %41, %62 : vector<32x128xf32>
    %64 = math.exp %63 : vector<32x128xf32>
    %cst_29 = arith.constant dense<0.000000e+00> : vector<32xf32>
    %65 = vector.multi_reduction <add>, %64, %cst_29 [1] : vector<32x128xf32> to vector<32xf32>
    %66 = vector.shape_cast %65 : vector<32xf32> to vector<32x1xf32>
    %67 = math.log %66 : vector<32x1xf32>
    %68 = arith.addf %43, %67 : vector<32x1xf32>
    %69 = vector.broadcast %68 : vector<32x1xf32> to vector<32x128xf32>
    %70 = arith.subf %41, %69 : vector<32x128xf32>
    %c0_30 = arith.constant 0 : index
    %c0_31 = arith.constant 0 : index
    %c0_32 = arith.constant 0 : index
    %71 = vector.load %arg8[%c0_30, %c0_31, %c0_32] : memref<1x32x128xf32, #tpu.memory_space<vmem>>, vector<1x32x128xf32>
    %72 = vector.shape_cast %71 : vector<1x32x128xf32> to vector<32x128xf32>
    %73 = vector.shape_cast %70 : vector<32x128xf32> to vector<1x32x128xf32>
    tpu.vector_store %arg8[%c0_30, %c0_31, %c0_32], %73 {strides = array<i32>} : memref<1x32x128xf32, #tpu.memory_space<vmem>>, vector<1x32x128xf32>,
    return
  }
  func.func @transform_0(%arg0: i32) -> (i32, i32) {
    %c0_i32 = arith.constant 0 : i32
    %c0_i32_0 = arith.constant 0 : i32
    %c0_i32_1 = arith.constant 0 : i32
    return %c0_i32, %c0_i32_0 : i32, i32
  }
  func.func @transform_1(%arg0: i32) -> (i32, i32) {
    %c0_i32 = arith.constant 0 : i32
    %c0_i32_0 = arith.constant 0 : i32
    %c0_i32_1 = arith.constant 0 : i32
    return %c0_i32, %c0_i32_0 : i32, i32
  }
  func.func @transform_2(%arg0: i32) -> (i32, i32) {
    %c0_i32 = arith.constant 0 : i32
    %c0_i32_0 = arith.constant 0 : i32
    %c0_i32_1 = arith.constant 0 : i32
    return %c0_i32, %c0_i32_0 : i32, i32
  }
  func.func @transform_3(%arg0: i32) -> (i32, i32) {
    %c0_i32 = arith.constant 0 : i32
    %c0_i32_0 = arith.constant 0 : i32
    %c0_i32_1 = arith.constant 0 : i32
    return %c0_i32, %c0_i32_0 : i32, i32
  }
  func.func @transform_4(%arg0: i32) -> (i32, i32) {
    %c0_i32 = arith.constant 0 : i32
    %c0_i32_0 = arith.constant 0 : i32
    %c0_i32_1 = arith.constant 0 : i32
    return %c0_i32, %c0_i32_0 : i32, i32
  }
  func.func @transform_5(%arg0: i32) -> (i32, i32) {
    %c0_i32 = arith.constant 0 : i32
    %c0_i32_0 = arith.constant 0 : i32
    %c0_i32_1 = arith.constant 0 : i32
    return %c0_i32, %c0_i32_0 : i32, i32
  }
  func.func @transform_6(%arg0: i32) -> (i32, i32) {
    %c0_i32 = arith.constant 0 : i32
    %c0_i32_0 = arith.constant 0 : i32
    %c0_i32_1 = arith.constant 0 : i32
    return %c0_i32, %c0_i32_0 : i32, i32
  }
  func.func @transform_7(%arg0: i32) -> (i32, i32, i32) {
    %c0_i32 = arith.constant 0 : i32
    %c0_i32_0 = arith.constant 0 : i32
    %c0_i32_1 = arith.constant 0 : i32
    return %arg0, %c0_i32, %c0_i32_0 : i32, i32, i32
  }
  func.func @transform_8(%arg0: i32) -> (i32, i32) {
    %c0_i32 = arith.constant 0 : i32
    %c0_i32_0 = arith.constant 0 : i32
    %c0_i32_1 = arith.constant 0 : i32
    return %c0_i32, %c0_i32_0 : i32, i32
  }
  func.func @transform_9(%arg0: i32) -> (i32, i32) {
    %c0_i32 = arith.constant 0 : i32
    %c0_i32_0 = arith.constant 0 : i32
    %c0_i32_1 = arith.constant 0 : i32
    return %c0_i32, %c0_i32_0 : i32, i32
  }
}

</mosaic_0001>

<bundles_post_ra>
// kernel: tpu_custom_call.1
= control target key start
LH: loop header
LB: loop body
LE: loop exit
PB: predicated region body
PF: predicated region fallthrough
CT: control target
= control target key end

     0   :  { %s2741_s0 = inlined_call_operand.hbm [shape: f32[32,128], index: 0, kind: input, shape index: {}]   ;;  %s2742_s1 = inlined_call_operand.hbm [shape: f32[32,128], index: 1, kind: input, shape index: {}]   ;;  %s2743_s2 = inlined_call_operand.hbm [shape: f32[32,128], index: 2, kind: input, shape index: {}]   ;;  %s2744_s3 = inlined_call_operand.hbm [shape: f32[128,512], index: 3, kind: input, shape index: {}]   ;;  %s2745_s4 = inlined_call_operand.hbm [shape: bf16[128,512], index: 4, kind: input, shape index: {}]   ;;  %s2746_s5 = inlined_call_operand.hbm [shape: bf16[128,128], index: 5, kind: input, shape index: {}]   ;;  %s2747_s6 = inlined_call_operand.vmem [shape: f32[1,128], index: 6, kind: input, shape index: {}]   ;;  %s2748_s7 = inlined_call_operand.hbm [shape: f32[8,32,128], index: 7, kind: output, shape index: {0}]   ;;  %s2749_s8 = inlined_call_operand.hbm [shape: f32[32,128], index: 8, kind: output, shape index: {1}]   ;;  %s2750_s9 = inlined_call_operand.hbm [shape: f32[32,128], index: 9, kind: output, shape index: {2}]  }
   0x1   :  { %2763 = sst [smem:[#allocation29_spill]] %s2742_s1 }
   0x2   :  { %15 = vsyncpa [#allocation5], 0 }
   0x3   :  { %16 = vsyncpa [#allocation8], 0 }
   0x4   :  { %17 = vsyncpa [#allocation11], 0 }
   0x5   :  { %18 = vsyncpa [#allocation14], 0 }
   0x6   :  { %19 = vsyncpa [#allocation6], 0 }
   0x7   :  { %21 = vsyncpa [#allocation6 + $0x1], 0 }
   0x8   :  { %22 = vsyncpa [#allocation17], 0  ;;  %s2318_s30 = smov 0   ;;  %s2320_s10 = smov 0  }
   0x9   :  { %s2322_s11 = smov 0   ;;  %s2324_s12 = smov 0  }
   0xa LB: > { %2764 = sst [smem:[#allocation25_spill]] %s2241_s11  ;;  %s2339_s13 = sadd.s32 4294967295, %s2245_s12   ;;  %s2245_s12 = sphi %s2324_s12, %s2796_s12   ;;  %s2241_s11 = sphi %s2322_s11, %s2798_s11   ;;  %s2237_s10 = sphi %s2320_s10, %s2800_s10   ;;  %s2233_s30 = sphi %s2318_s30, %s2799_s30  }
   0xb   : > { %s1503_s14 = sadd.s32 4294967294, %s2245_s12   ;;  %s2343_s15 = sadd.s32 1, %s2245_s12  }
   0xc   : > { %2765 = sst [smem:[#allocation26_spill]] %s2343_s15  ;;  %s182_s16 = sadd.s32 1, %s2241_s11 }
   0xd   : > { %s179_s17 = ssub.s32 %s2245_s12, %s2343_s15  ;;  %p192_p0 = scmp.ne.s32.totalorder %s2241_s11, %s2237_s10 }
   0xe   : > { %p180_p1 = scmp.eq.s32.totalorder %s179_s17, 0  ;;  %p2751_p2 = scmp.eq.s32.totalorder %s2339_s13, 7 }
   0xf   : > { %p198_p3 = scmp.ne.s32.totalorder %s2237_s10, %s2233_s30  ;;  %p199_p4 = scmp.eq.s32.totalorder %s1503_s14, 7 }
  0x10   : > { %s2354_s18 = scalar_select %p180_p1, %s2241_s11, %s182_s16  }
  0x11   : > { %p2358_p5 = por %p2751_p2, %p192_p0  ;;  %p2362_p6 = por %p199_p4, %p198_p3 }
  0x12   : > { %2766 = sst [smem:[#allocation27_spill]] %s2354_s18  ;;  %p1504_p7 = scmp.ge.s32.totalorder %s2245_s12, 1 }
  0x13   : > { %s2767_s19 = scalar_select %p2358_p5, 1, 0 }
  0x14   : > { %s2768_s20 = scalar_select %p2362_p6, 1, 0 }
  0x15   : > { %p248_p8 = scmp.lt.s32.totalorder %s2245_s12, 9  ;;  %p2752_p10 = scmp.eq.s32.totalorder %s2339_s13, 0 }
  0x16   : > { %2769 = sst [smem:[#allocation28_spill]] %s2768_s20  ;;  %s2247_s22 = smov [#allocation7]  }
  0x17   : > { %p2370_p11 = pnand %p1504_p7, %p248_p8  ;;  %s273_s23 = sshll.u32 %s2247_s22, 4  ;;  %s274_s23 = int_to_ptr.vmem [resolvable:$true] %s273_s23 }
  0x18   : > { %s2248_s25 = smov [#allocation10]   ;;  %s2772_s1 = sld [smem:[#allocation29_spill]] }
  0x19   : > { %s2770_s21 = scalar_select %p2370_p11, 1, 0 }
  0x1a   : > { %p1715_p12 = pneg %p2370_p11  ;;  %s299_s26 = sshll.u32 %s2248_s25, 4  ;;  %s2382_s26 = int_to_ptr.vmem [resolvable:$true] %s299_s26 }
  0x1c   : > { %p2378_p13 = pnand %p2752_p10, %p1715_p12 }
  0x1e   : > { %s1943_s29 = scalar_lea.hbm %s2772_s1, 512  ;;  %p2392_p1 = pneg %p2378_p13 }
  0x1f   : > { %p1944_p0 = scmp.ne.s32.totalorder %s2772_s1, %s1943_s29  ;;  %p1950_p7 = scmp.lt.u32.totalorder %s1943_s29, %s2772_s1 }
  0x21   : > { %p1946_p3 = pnand %p2392_p1, %p1944_p0 }
  0x23   : > { %p1947_p4 = pneg %p1946_p3 }
  0x25   : > { %p1952_p8 = pnand %p1950_p7, %p1947_p4 }
  0x27   : > { %1955 = shalt.err (!%p1952_p8)
}
  0x28   : > { %s1956_s27 = scalar_lea.vmem %s274_s23, 512  ;;  %p1964_p10 = scmp.lt.s32.totalorder %s274_s23, %s274_s23 }
  0x29   : > { %p1957_p12 = scmp.ne.s32.totalorder %s274_s23, %s1956_s27  ;;  %p1965_p6 = scmp.lt.s32.totalorder %s1956_s27, %s1956_s27 }
  0x2b   : > { %p1959_p2 = pnand %p1957_p12, %p2392_p1  ;;  %p1966_p5 = por %p1965_p6, %p1964_p10 }
  0x2d   : > { %p1960_p9 = pneg %p1959_p2 }
  0x2f   : > { %p1967_p11 = pnand %p1966_p5, %p1960_p9 }
  0x31   : > { %1970 = shalt.err (!%p1967_p11)
}
  0x32   : > { %s2759_s28 = smov 128   ;;  %s2761_s14 = smov 8  }
  0x33   : > { %1721 = dma.hbm_to_vmem [thread:$0]  (!%p2378_p13), %s2772_s1, 512, %s274_s23, [#allocation8], %s2759_s28, %s2759_s28, %s2761_s14  }
  0x34   : > { %s1971_s18 = scalar_lea.hbm %s2744_s3, 8192 }
  0x35   : > { %p1972_p2 = scmp.ne.s32.totalorder %s2744_s3, %s1971_s18  ;;  %p1978_p9 = scmp.lt.u32.totalorder %s1971_s18, %s2744_s3 }
  0x37   : > { %p1974_p5 = pnand %p1972_p2, %p2392_p1 }
  0x39   : > { %p1975_p6 = pneg %p1974_p5 }
  0x3b   : > { %p1980_p10 = pnand %p1978_p9, %p1975_p6 }
  0x3d   : > { %1983 = shalt.err (!%p1980_p10)
}
  0x3e   : > { %s1984_s23 = scalar_lea.vmem %s2382_s26, 8192  ;;  %p1992_p4 = scmp.lt.s32.totalorder %s2382_s26, %s2382_s26 }
  0x3f   : > { %p1985_p11 = scmp.ne.s32.totalorder %s2382_s26, %s1984_s23  ;;  %p1993_p7 = scmp.lt.s32.totalorder %s1984_s23, %s1984_s23 }
  0x41   : > { %p1987_p0 = pnand %p1985_p11, %p2392_p1  ;;  %p1994_p8 = por %p1993_p7, %p1992_p4 }
  0x43   : > { %p1988_p3 = pneg %p1987_p0 }
  0x45   : > { %p1995_p12 = pnand %p1994_p8, %p1988_p3 }
  0x47   : > { %1998 = shalt.err (!%p1995_p12)
}
  0x48   : > { %s2251_s11 = smov 512   ;;  %s2252_s15 = smov 32  }
  0x49   : > { %1727 = dma.hbm_to_vmem [thread:$0]  (!%p2378_p13), %s2744_s3, 8192, %s2382_s26, [#allocation11], %s2251_s11, %s2251_s11, %s2252_s15  }
  0x4a   : > { %s2253_s29 = smov [#allocation4]   ;;  %s2254_s22 = smov [#allocation9]  }
  0x4b   : > { %s260_s16 = sshll.u32 %s2253_s29, 4  ;;  %s286_s25 = sshll.u32 %s2254_s22, 4  ;;  %s261_s16 = int_to_ptr.vmem [resolvable:$true] %s260_s16  ;;  %s2434_s25 = int_to_ptr.vmem [resolvable:$true] %s286_s25 }
  0x4c   : > { %s1999_s28 = scalar_lea.hbm %s2741_s0, 512 }
  0x4d   : > { %p2000_p2 = scmp.ne.s32.totalorder %s2741_s0, %s1999_s28  ;;  %p2006_p9 = scmp.lt.u32.totalorder %s1999_s28, %s2741_s0 }
  0x4f   : > { %p2002_p5 = pnand %p2000_p2, %p2392_p1 }
  0x51   : > { %p2003_p6 = pneg %p2002_p5 }
  0x53   : > { %p2008_p10 = pnand %p2006_p9, %p2003_p6 }
  0x55   : > { %2011 = shalt.err (!%p2008_p10)
}
  0x56   : > { %s2012_s11 = scalar_lea.vmem %s261_s16, 512  ;;  %p2020_p4 = scmp.lt.s32.totalorder %s261_s16, %s261_s16 }
  0x57   : > { %p2013_p11 = scmp.ne.s32.totalorder %s261_s16, %s2012_s11  ;;  %p2021_p7 = scmp.lt.s32.totalorder %s2012_s11, %s2012_s11 }
  0x59   : > { %p2015_p0 = pnand %p2013_p11, %p2392_p1  ;;  %p2022_p8 = por %p2021_p7, %p2020_p4 }
  0x5b   : > { %p2016_p3 = pneg %p2015_p0 }
  0x5d   : > { %p2023_p12 = pnand %p2022_p8, %p2016_p3 }
  0x5f   : > { %2026 = shalt.err (!%p2023_p12)
}
  0x60   : > { %s2774_s1 = smov 8   ;;  %s2775_s14 = smov 128  }
  0x61   : > { %1718 = dma.hbm_to_vmem [thread:$0]  (!%p2378_p13), %s2741_s0, 512, %s261_s16, [#allocation5], %s2775_s14, %s2775_s14, %s2774_s1  }
  0x62   : > { %s2027_s22 = scalar_lea.hbm %s2743_s2, 512 }
  0x63   : > { %p2028_p2 = scmp.ne.s32.totalorder %s2743_s2, %s2027_s22  ;;  %p2034_p9 = scmp.lt.u32.totalorder %s2027_s22, %s2743_s2 }
  0x65   : > { %p2030_p5 = pnand %p2028_p2, %p2392_p1 }
  0x67   : > { %p2031_p6 = pneg %p2030_p5 }
  0x69   : > { %p2036_p10 = pnand %p2034_p9, %p2031_p6 }
  0x6b   : > { %2039 = shalt.err (!%p2036_p10)
}
  0x6c   : > { %s2040_s16 = scalar_lea.vmem %s2434_s25, 512  ;;  %p2048_p4 = scmp.lt.s32.totalorder %s2434_s25, %s2434_s25 }
  0x6d   : > { %p2041_p11 = scmp.ne.s32.totalorder %s2434_s25, %s2040_s16  ;;  %p2049_p7 = scmp.lt.s32.totalorder %s2040_s16, %s2040_s16 }
  0x6f   : > { %p2043_p0 = pnand %p2041_p11, %p2392_p1  ;;  %p2050_p8 = por %p2049_p7, %p2048_p4 }
  0x71   : > { %p2044_p3 = pneg %p2043_p0 }
  0x73   : > { %p2051_p12 = pnand %p2050_p8, %p2044_p3 }
  0x75   : > { %2054 = shalt.err (!%p2051_p12)
}
  0x76   : > { %1724 = dma.hbm_to_vmem [thread:$0]  (!%p2378_p13), %s2743_s2, 512, %s2434_s25, [#allocation8], %s2775_s14, %s2775_s14, %s2774_s1  }
  0x77   : > { %s2255_s28 = smov [#allocation12]   ;;  %s2055_s27 = scalar_lea.hbm %s2745_s4, 4096 }
  0x78   : > { %s312_s20 = sshll.u32 %s2255_s28, 4  ;;  %p2056_p2 = scmp.ne.s32.totalorder %s2745_s4, %s2055_s27  ;;  %s313_s20 = int_to_ptr.vmem [resolvable:$true] %s312_s20 }
  0x79   : > { %p2062_p9 = scmp.lt.u32.totalorder %s2055_s27, %s2745_s4 }
  0x7a   : > { %p2058_p5 = pnand %p2056_p2, %p2392_p1 }
  0x7c   : > { %p2059_p6 = pneg %p2058_p5 }
  0x7e   : > { %p2064_p10 = pnand %p2062_p9, %p2059_p6 }
  0x80   : > { %2067 = shalt.err (!%p2064_p10)
}
  0x81   : > { %s2068_s25 = scalar_lea.vmem %s313_s20, 4096  ;;  %p2076_p4 = scmp.lt.s32.totalorder %s313_s20, %s313_s20 }
  0x82   : > { %p2069_p11 = scmp.ne.s32.totalorder %s313_s20, %s2068_s25  ;;  %p2077_p7 = scmp.lt.s32.totalorder %s2068_s25, %s2068_s25 }
  0x84   : > { %p2071_p0 = pnand %p2069_p11, %p2392_p1  ;;  %p2078_p8 = por %p2077_p7, %p2076_p4 }
  0x86   : > { %p2072_p3 = pneg %p2071_p0 }
  0x88   : > { %p2079_p12 = pnand %p2078_p8, %p2072_p3 }
  0x8a   : > { %2082 = shalt.err (!%p2079_p12)
}
  0x8b   : > { %s2256_s1 = smov 256   ;;  %s2257_s14 = smov 16  }
  0x8c   : > { %1730 = dma.hbm_to_vmem [thread:$0]  (!%p2378_p13), %s2745_s4, 4096, %s313_s20, [#allocation11], %s2256_s1, %s2256_s1, %s2257_s14  }
  0x8d   : > { %s2258_s28 = smov [#allocation13]   ;;  %s2083_s23 = scalar_lea.hbm %s2746_s5, 1024 }
  0x8e   : > { %s325_s29 = sshll.u32 %s2258_s28, 4  ;;  %p2084_p2 = scmp.ne.s32.totalorder %s2746_s5, %s2083_s23  ;;  %s326_s29 = int_to_ptr.vmem [resolvable:$true] %s325_s29 }
  0x8f   : > { %p2090_p9 = scmp.lt.u32.totalorder %s2083_s23, %s2746_s5 }
  0x90   : > { %p2086_p5 = pnand %p2084_p2, %p2392_p1 }
  0x92   : > { %p2087_p6 = pneg %p2086_p5 }
  0x94   : > { %p2092_p10 = pnand %p2090_p9, %p2087_p6 }
  0x96   : > { %2095 = shalt.err (!%p2092_p10)
}
  0x97   : > { %s2096_s20 = scalar_lea.vmem %s326_s29, 1024  ;;  %p2104_p4 = scmp.lt.s32.totalorder %s326_s29, %s326_s29 }
  0x98   : > { %p2097_p11 = scmp.ne.s32.totalorder %s326_s29, %s2096_s20  ;;  %p2105_p7 = scmp.lt.s32.totalorder %s2096_s20, %s2096_s20 }
  0x9a   : > { %p2099_p0 = pnand %p2097_p11, %p2392_p1  ;;  %p2106_p8 = por %p2105_p7, %p2104_p4 }
  0x9c   : > { %p2100_p3 = pneg %p2099_p0 }
  0x9e   : > { %p2107_p12 = pnand %p2106_p8, %p2100_p3 }
  0xa0   : > { %2110 = shalt.err (!%p2107_p12)
}
  0xa1   : > { %s2259_s1 = smov 64   ;;  %s2260_s14 = smov 4  }
  0xa2   : > { %1733 = dma.hbm_to_vmem [thread:$0]  (!%p2378_p13), %s2746_s5, 1024, %s326_s29, [#allocation14], %s2259_s1, %s2259_s1, %s2260_s14  }
  0xa3   : > { %p2776_p2 = scmp.ne.s32.totalorder %s2770_s21, 0 }
  0xa4   : > { %p2777_p5 = scmp.eq.s32.totalorder (!%p2776_p2), %s2339_s13, 0 }
  0xa5   : > { %344 = sbr.rel (%p2776_p2) target bundleno = 1201 (0x4b1), region = 48 }
  0xac   : > { %2208 = dma.done.wait (%p2777_p5), [#allocation5], 512   ;;  %p2778_p1 = pmov %p2777_p5 }
  0xae   : > { %2210 = vsyncadd (%p2778_p1), [#allocation5], 4294966784  ;;  %p2779_p6 = pmov %p2778_p1 }
  0xaf   : > { %p2780_p9 = pmov %p2778_p1 }
  0xb0   : > { %2212 = dma.done.wait (%p2779_p6), [#allocation8], 1024  }
  0xb1   : > { %2214 = vsyncadd (%p2780_p9), [#allocation8], 4294966272  ;;  %p2781_p10 = pmov %p2778_p1 }
  0xb2   : > { %p2782_p13 = pmov %p2778_p1 }
  0xb3   : > { %2216 = dma.done.wait (%p2781_p10), [#allocation11], 12288  }
  0xb4   : > { %2218 = vsyncadd (%p2782_p13), [#allocation11], 4294955008  ;;  %p2783_p11 = pmov %p2778_p1 }
  0xb5   : > { %p2784_p0 = pmov %p2778_p1 }
  0xb6   : > { %2220 = dma.done.wait (%p2783_p11), [#allocation14], 1024  }
  0xb7   : > { %2222 = vsyncadd (%p2784_p0), [#allocation14], 4294966272  ;;  %s388_s21 = sand.u32 1, %s2237_s10   ;;  %p2785_p3 = scmp.ne.s32.totalorder %s2339_s13, 0 }
  0xb8   : > { %s1518_s24 = sshll.u32 %s388_s21, 5  ;;  %v400_v0 = vld [vmem:[#allocation4] sm:$0xff] (!%p2785_p3)  ;;  %v401_v1 = vld [vmem:[#allocation4 + $0x8] sm:$0xff] (!%p2785_p3)  ;;  %v402_v2 = vld [vmem:[#allocation4 + $0x10] sm:$0xff] (!%p2785_p3) }
  0xb9   : > { %s2540_s17 = scalar_lea.vmem [#allocation15], %s1518_s24  ;;  %399 = sbr.rel (%p2785_p3) target bundleno = 193 (0xc1), region = 76  ;;  %404 = vst [vmem:[#allocation2] sm:$0xff] (!%p2785_p3), %v400_v0  ;;  %405 = vst [vmem:[#allocation2 + $0x8] sm:$0xff] (!%p2785_p3), %v401_v1  ;;  %v403_v3 = vld [vmem:[#allocation4 + $0x18] sm:$0xff] (!%p2785_p3)  ;;  %v408_v4 = vld [vmem:[#allocation9] sm:$0xff] (!%p2785_p3) }
  0xba   : > { %406 = vst [vmem:[#allocation2 + $0x10] sm:$0xff] (!%p2785_p3), %v402_v2  ;;  %v409_v5 = vld [vmem:[#allocation9 + $0x8] sm:$0xff] (!%p2785_p3)  ;;  %407 = vst [vmem:[#allocation2 + $0x18] sm:$0xff] (!%p2785_p3), %v403_v3  ;;  %v410_v6 = vld [vmem:[#allocation9 + $0x10] sm:$0xff] (!%p2785_p3) }
  0xbb   : > { %412 = vst [vmem:[#allocation18] sm:$0xff] (!%p2785_p3), %v408_v4  ;;  %413 = vst [vmem:[#allocation18 + $0x8] sm:$0xff] (!%p2785_p3), %v409_v5  ;;  %v411_v7 = vld [vmem:[#allocation9 + $0x18] sm:$0xff] (!%p2785_p3)  ;;  %v416_v8 = vld [vmem:[#allocation7] sm:$0xff] (!%p2785_p3) }
  0xbc   : > { %414 = vst [vmem:[#allocation18 + $0x10] sm:$0xff] (!%p2785_p3), %v410_v6  ;;  %415 = vst [vmem:[#allocation18 + $0x18] sm:$0xff] (!%p2785_p3), %v411_v7  ;;  %v417_v9 = vld [vmem:[#allocation7 + $0x8] sm:$0xff] (!%p2785_p3)  ;;  %v418_v10 = vld [vmem:[#allocation7 + $0x10] sm:$0xff] (!%p2785_p3) }
  0xbd   : > { %v419_v11 = vld [vmem:[#allocation7 + $0x18] sm:$0xff] (!%p2785_p3)  ;;  %v420_v12 = vpack.c.bf16 (!%p2785_p3), %v417_v9, %v416_v8 }
  0xbe   : > { %v421_v13 = vpack.c.bf16 (!%p2785_p3), %v419_v11, %v418_v10 }
  0xbf   : > { %422 = vst [vmem:[#allocation3] sm:$0xff] (!%p2785_p3), %v420_v12 }
  0xc0   : > { %423 = vst [vmem:[#allocation3 + $0x8] sm:$0xff] %v421_v13 }
  0xc1 PF: > { %v1807_v14 = vld [vmem:[#allocation12 + $0x4] ss:$16 sps:$4 sm:$0xff]   ;;  %v1809_v15 = vld [vmem:[#allocation12 + $0xc] ss:$16 sps:$4 sm:$0xff]   ;;  %v2261_v16 = vmov 0   ;;  %s2263_s22 = smov [#allocation16]  }
  0xc2   : > { %722 = vmatprep.mubr.bf16.mxu0 %v2261_v16  ;;  %775 = vmatprep.mubr.bf16.mxu1 %v2261_v16  ;;  %v1811_v17 = vld [vmem:[#allocation12] ss:$16 sps:$4 sm:$0xff]   ;;  %v1812_v18 = vld [vmem:[#allocation12 + $0x8] ss:$16 sps:$4 sm:$0xff]   ;;  %v1813_v19 = vld [vmem:[#allocation12 + $0x24] ss:$16 sps:$4 sm:$0xff]  }
  0xc3   : > { %690 = vmatprep.subr.bf16.mxu0 %v1807_v14  ;;  %743 = vmatprep.subr.bf16.mxu1 %v1809_v15  ;;  %v1815_v20 = vld [vmem:[#allocation12 + $0x2c] ss:$16 sps:$4 sm:$0xff]   ;;  %v1817_v21 = vld [vmem:[#allocation12 + $0x20] ss:$16 sps:$4 sm:$0xff]   ;;  %v1818_v22 = vld [vmem:[#allocation12 + $0x28] ss:$16 sps:$4 sm:$0xff]  }
  0xc4   : > { %691 = vmatpush1.bf16.msra.mxu0 %v1811_v17  ;;  %744 = vmatpush1.bf16.msra.mxu1 %v1812_v18  ;;  %v1819_v23 = vld [vmem:[#allocation12 + $0x44] ss:$16 sps:$4 sm:$0xff]   ;;  %v1821_v24 = vld [vmem:[#allocation12 + $0x4c] ss:$16 sps:$4 sm:$0xff]   ;;  %v1823_v25 = vld [vmem:[#allocation12 + $0x40] ss:$16 sps:$4 sm:$0xff]  }
  0xc5   : > { %692 = vmatprep.subr.bf16.mxu0 %v1813_v19  ;;  %745 = vmatprep.subr.bf16.mxu1 %v1815_v20  ;;  %v1824_v26 = vld [vmem:[#allocation12 + $0x48] ss:$16 sps:$4 sm:$0xff]   ;;  %v1825_v27 = vld [vmem:[#allocation12 + $0x64] ss:$16 sps:$4 sm:$0xff]   ;;  %v1827_v28 = vld [vmem:[#allocation12 + $0x6c] ss:$16 sps:$4 sm:$0xff]  }
  0xc6   : > { %v1829_v29 = vld [vmem:[#allocation12 + $0x60] ss:$16 sps:$4 sm:$0xff]   ;;  %v1830_v30 = vld [vmem:[#allocation12 + $0x68] ss:$16 sps:$4 sm:$0xff]   ;;  %v1831_v31 = vld [vmem:[#allocation12 + $0x84] ss:$16 sps:$4 sm:$0xff]  }
  0xc7   : > { %v1833_v32 = vld [vmem:[#allocation12 + $0x8c] ss:$16 sps:$4 sm:$0xff]   ;;  %v1835_v33 = vld [vmem:[#allocation12 + $0x80] ss:$16 sps:$4 sm:$0xff]   ;;  %v1836_v34 = vld [vmem:[#allocation12 + $0x88] ss:$16 sps:$4 sm:$0xff]  }
  0xc8   : > { %693 = vmatpush1.bf16.msra.mxu0 %v1817_v21  ;;  %746 = vmatpush1.bf16.msra.mxu1 %v1818_v22  ;;  %v1837_v35 = vld [vmem:[#allocation12 + $0xa4] ss:$16 sps:$4 sm:$0xff]   ;;  %v1839_v36 = vld [vmem:[#allocation12 + $0xac] ss:$16 sps:$4 sm:$0xff]   ;;  %v1841_v37 = vld [vmem:[#allocation12 + $0xa0] ss:$16 sps:$4 sm:$0xff]  }
  0xc9   : > { %694 = vmatprep.subr.bf16.mxu0 %v1819_v23  ;;  %747 = vmatprep.subr.bf16.mxu1 %v1821_v24  ;;  %v1842_v38 = vld [vmem:[#allocation12 + $0xa8] ss:$16 sps:$4 sm:$0xff]   ;;  %v1843_v39 = vld [vmem:[#allocation12 + $0xc4] ss:$16 sps:$4 sm:$0xff]   ;;  %v1845_v40 = vld [vmem:[#allocation12 + $0xcc] ss:$16 sps:$4 sm:$0xff]  }
  0xca   : > { %v1847_v41 = vld [vmem:[#allocation12 + $0xc0] ss:$16 sps:$4 sm:$0xff]   ;;  %v1848_v42 = vld [vmem:[#allocation12 + $0xc8] ss:$16 sps:$4 sm:$0xff]   ;;  %v1849_v43 = vld [vmem:[#allocation12 + $0xe4] ss:$16 sps:$4 sm:$0xff]  }
  0xcb   : > { %v1851_v44 = vld [vmem:[#allocation12 + $0xec] ss:$16 sps:$4 sm:$0xff]   ;;  %v1853_v49 = vld [vmem:[#allocation12 + $0xe0] ss:$16 sps:$4 sm:$0xff]   ;;  %v1854_v50 = vld [vmem:[#allocation12 + $0xe8] ss:$16 sps:$4 sm:$0xff]  }
  0xcc   : > { %695 = vmatpush1.bf16.msra.mxu0 %v1823_v25  ;;  %748 = vmatpush1.bf16.msra.mxu1 %v1824_v26  ;;  %v433_v45 = vld [vmem:[#allocation10 + $0x8] sm:$0xff]  ;;  %v435_v47 = vld [vmem:[#allocation10 + $0x18] sm:$0xff]  ;;  %v432_v51 = vld [vmem:[#allocation10] sm:$0xff]  ;;  %s1359_s27 = sshll.u32 %s2263_s22, 4  ;;  %s1586_s23 = sshll.u32 %s2339_s13, 9  ;;  %s1360_s27 = int_to_ptr.vmem [resolvable:$true] %s1359_s27 }
  0xcd   : > { %696 = vmatprep.subr.bf16.mxu0 %v1825_v27  ;;  %749 = vmatprep.subr.bf16.mxu1 %v1827_v28  ;;  %v437_v46 = vld [vmem:[#allocation10 + $0x28] sm:$0xff]  ;;  %v439_v48 = vld [vmem:[#allocation10 + $0x38] sm:$0xff]  ;;  %v436_v52 = vld [vmem:[#allocation10 + $0x20] sm:$0xff]  ;;  %s2628_s16 = scalar_lea.hbm %s2748_s7, %s1586_s23  ;;  %s2111_s25 = scalar_lea.vmem %s1360_s27, 512 }
  0xce   : > { %v1617_v53 = vpack.c.bf16 %v437_v46, %v433_v45  ;;  %v1649_v54 = vpack.c.bf16 %v439_v48, %v435_v47  ;;  %v434_v55 = vld [vmem:[#allocation10 + $0x10] sm:$0xff]  ;;  %v441_v57 = vld [vmem:[#allocation10 + $0x48] sm:$0xff]  ;;  %v443_v59 = vld [vmem:[#allocation10 + $0x58] sm:$0xff]  ;;  %v1619_v62 = vpack.c.bf16 %v436_v52, %v432_v51  ;;  %v2262_v47 = vmov 0.0   ;;  %p2112_p4 = scmp.ne.s32.totalorder %s1360_s27, %s2111_s25  ;;  %p2786_p7 = scmp.eq.s32.totalorder %s2339_s13, 7 }
  0xcf   : > { %v438_v56 = vld [vmem:[#allocation10 + $0x30] sm:$0xff]  ;;  %v445_v58 = vld [vmem:[#allocation10 + $0x68] sm:$0xff]  ;;  %v447_v60 = vld [vmem:[#allocation10 + $0x78] sm:$0xff]  ;;  %p2118_p2 = scmp.lt.s32.totalorder %s1360_s27, %s1360_s27  ;;  %p2119_p5 = scmp.lt.s32.totalorder %s2111_s25, %s2111_s25 }
  0xd0   : > { %697 = vmatpush1.bf16.msra.mxu0 %v1829_v29  ;;  %750 = vmatpush1.bf16.msra.mxu1 %v1830_v30  ;;  %v496_v61 = vld [vmem:[#allocation3] sm:$0xff]  ;;  %v1651_v63 = vpack.c.bf16 %v438_v56, %v434_v55  ;;  %v440_v0 = vld [vmem:[#allocation10 + $0x40] sm:$0xff]  ;;  %v1621_v2 = vpack.c.bf16 %v445_v58, %v441_v57  ;;  %v1653_v3 = vpack.c.bf16 %v447_v60, %v443_v59  ;;  %v449_v6 = vld [vmem:[#allocation10 + $0x88] sm:$0xff]  ;;  %p2113_p8 = pnand %p2112_p4, %p2786_p7 }
  0xd1   : > { %698 = vmatprep.subr.bf16.mxu0 %v1831_v31  ;;  %751 = vmatprep.subr.bf16.mxu1 %v1833_v32  ;;  %v444_v1 = vld [vmem:[#allocation10 + $0x60] sm:$0xff]  ;;  %v442_v4 = vld [vmem:[#allocation10 + $0x50] sm:$0xff]  ;;  %v453_v7 = vld [vmem:[#allocation10 + $0xa8] sm:$0xff]  ;;  %p2120_p1 = por %p2119_p5, %p2118_p2 }
  0xd2   : > { %v446_v5 = vld [vmem:[#allocation10 + $0x70] sm:$0xff]  ;;  %v451_v8 = vld [vmem:[#allocation10 + $0x98] sm:$0xff]  ;;  %v1623_v10 = vpack.c.bf16 %v444_v1, %v440_v0  ;;  %v448_v12 = vld [vmem:[#allocation10 + $0x80] sm:$0xff]  ;;  %v1625_v14 = vpack.c.bf16 %v453_v7, %v449_v6  ;;  %p2114_p12 = pneg %p2113_p8 }
  0xd3   : > { %v455_v9 = vld [vmem:[#allocation10 + $0xb8] sm:$0xff]  ;;  %v1655_v11 = vpack.c.bf16 %v446_v5, %v442_v4  ;;  %v452_v13 = vld [vmem:[#allocation10 + $0xa0] sm:$0xff]  ;;  %v450_v17 = vld [vmem:[#allocation10 + $0x90] sm:$0xff] }
  0xd4   : > { %699 = vmatpush1.bf16.msra.mxu0 %v1835_v33  ;;  %752 = vmatpush1.bf16.msra.mxu1 %v1836_v34  ;;  %v1657_v15 = vpack.c.bf16 %v455_v9, %v451_v8  ;;  %v454_v18 = vld [vmem:[#allocation10 + $0xb0] sm:$0xff]  ;;  %v457_v19 = vld [vmem:[#allocation10 + $0xc8] sm:$0xff]  ;;  %v459_v21 = vld [vmem:[#allocation10 + $0xd8] sm:$0xff]  ;;  %v1627_v23 = vpack.c.bf16 %v452_v13, %v448_v12  ;;  %p2121_p6 = pnand %p2120_p1, %p2114_p12 }
  0xd5   : > { %700 = vmatprep.subr.bf16.mxu0 %v1837_v35  ;;  %753 = vmatprep.subr.bf16.mxu1 %v1839_v36  ;;  %v461_v20 = vld [vmem:[#allocation10 + $0xe8] sm:$0xff]  ;;  %v463_v22 = vld [vmem:[#allocation10 + $0xf8] sm:$0xff]  ;;  %v1659_v24 = vpack.c.bf16 %v454_v18, %v450_v17  ;;  %v456_v25 = vld [vmem:[#allocation10 + $0xc0] sm:$0xff] }
  0xd6   : > { %v460_v26 = vld [vmem:[#allocation10 + $0xe0] sm:$0xff]  ;;  %v497_v27 = vld [vmem:[#allocation3 + $0x8] sm:$0xff]  ;;  %v1629_v28 = vpack.c.bf16 %v461_v20, %v457_v19  ;;  %v1661_v29 = vpack.c.bf16 %v463_v22, %v459_v21  ;;  %v458_v30 = vld [vmem:[#allocation10 + $0xd0] sm:$0xff] }
  0xd7   : > { %v462_v31 = vld [vmem:[#allocation10 + $0xf0] sm:$0xff]  ;;  %v465_v32 = vld [vmem:[#allocation10 + $0x108] sm:$0xff]  ;;  %v467_v34 = vld [vmem:[#allocation10 + $0x118] sm:$0xff] }
  0xd8   : > { %701 = vmatpush1.bf16.msra.mxu0 %v1841_v37  ;;  %754 = vmatpush1.bf16.msra.mxu1 %v1842_v38  ;;  %v469_v33 = vld [vmem:[#allocation10 + $0x128] sm:$0xff]  ;;  %v471_v35 = vld [vmem:[#allocation10 + $0x138] sm:$0xff]  ;;  %v464_v36 = vld [vmem:[#allocation10 + $0x100] sm:$0xff] }
  0xd9   : > { %702 = vmatprep.subr.bf16.mxu0 %v1843_v39  ;;  %755 = vmatprep.subr.bf16.mxu1 %v1845_v40  ;;  %v468_v37 = vld [vmem:[#allocation10 + $0x120] sm:$0xff]  ;;  %v470_v38 = vld [vmem:[#allocation10 + $0x130] sm:$0xff]  ;;  %v1631_v39 = vpack.c.bf16 %v460_v26, %v456_v25  ;;  %v1663_v40 = vpack.c.bf16 %v462_v31, %v458_v30  ;;  %v1633_v45 = vpack.c.bf16 %v469_v33, %v465_v32  ;;  %v485_v57 = vld [vmem:[#allocation10 + $0x1a8] sm:$0xff] }
  0xda   : > { %v1665_v46 = vpack.c.bf16 %v471_v35, %v467_v34  ;;  %v472_v48 = vld [vmem:[#allocation10 + $0x140] sm:$0xff]  ;;  %v478_v51 = vld [vmem:[#allocation10 + $0x170] sm:$0xff]  ;;  %v1635_v52 = vpack.c.bf16 %v468_v37, %v464_v36  ;;  %v483_v58 = vld [vmem:[#allocation10 + $0x198] sm:$0xff] }
  0xdb   : > { %v487_v59 = vld [vmem:[#allocation10 + $0x1b8] sm:$0xff]  ;;  %v489_v4 = vld [vmem:[#allocation10 + $0x1c8] sm:$0xff]  ;;  %v492_v13 = vld [vmem:[#allocation10 + $0x1e0] sm:$0xff] }
  0xdc   : > { %703 = vmatpush1.bf16.msra.mxu0 %v1847_v41  ;;  %756 = vmatpush1.bf16.msra.mxu1 %v1848_v42  ;;  %v473_v41 = vld [vmem:[#allocation10 + $0x148] sm:$0xff]  ;;  %v1673_v1 = vpack.c.bf16 %v487_v59, %v483_v58  ;;  %v491_v6 = vld [vmem:[#allocation10 + $0x1d8] sm:$0xff]  ;;  %v428_v19 = vld [vmem:[#allocation2] sm:$0xff] }
  0xdd   : > { %704 = vmatprep.subr.bf16.mxu0 %v1849_v43  ;;  %757 = vmatprep.subr.bf16.mxu1 %v1851_v44  ;;  %v477_v42 = vld [vmem:[#allocation10 + $0x168] sm:$0xff]  ;;  %v475_v43 = vld [vmem:[#allocation10 + $0x158] sm:$0xff]  ;;  %v430_v21 = vld [vmem:[#allocation2 + $0x10] sm:$0xff] }
  0xde   : > { %v479_v44 = vld [vmem:[#allocation10 + $0x178] sm:$0xff]  ;;  %v1637_v55 = vpack.c.bf16 %v477_v42, %v473_v41  ;;  %v493_v5 = vld [vmem:[#allocation10 + $0x1e8] sm:$0xff]  ;;  %v1857_v25 = vld [vmem:[#allocation13 + $0x10] sm:$0xff]  }
  0xdf   : > { %v1669_v56 = vpack.c.bf16 %v479_v44, %v475_v43  ;;  %v495_v7 = vld [vmem:[#allocation10 + $0x1f8] sm:$0xff]  ;;  %v431_v22 = vld [vmem:[#allocation2 + $0x18] sm:$0xff] }
  0xe0   : > { %705 = vmatpush1.bf16.msra.mxu0 %v1853_v49  ;;  %758 = vmatpush1.bf16.msra.mxu1 %v1854_v50  ;;  %v476_v49 = vld [vmem:[#allocation10 + $0x160] sm:$0xff]  ;;  %v474_v50 = vld [vmem:[#allocation10 + $0x150] sm:$0xff]  ;;  %v1677_v12 = vpack.c.bf16 %v495_v7, %v491_v6  ;;  %v429_v20 = vld [vmem:[#allocation2 + $0x8] sm:$0xff] }
  0xe1   : > { %1618 = vmatprep.subr.bf16.mxu0 %v1617_v53  ;;  %1650 = vmatprep.subr.bf16.mxu1 %v1649_v54  ;;  %v481_v54 = vld [vmem:[#allocation10 + $0x188] sm:$0xff]  ;;  %v1639_v60 = vpack.c.bf16 %v476_v49, %v472_v48  ;;  %v1858_v26 = vld [vmem:[#allocation13 + $0x18] sm:$0xff]  }
  0xe2   : > { %v1641_v0 = vpack.c.bf16 %v485_v57, %v481_v54  ;;  %v1862_v30 = vld [vmem:[#allocation13 + $0x38] sm:$0xff]  }
  0xe3   : > { %723 = vmatmul.mubr.bf16.vlgmr.msra.gmra.mrb[0].mxu0 %v496_v61  ;;  %776 = vmatmul.mubr.bf16.vlgmr.msra.gmra.mrb[0].mxu1 %v496_v61  ;;  %v1671_v61 = vpack.c.bf16 %v478_v51, %v474_v50 }
  0xe4   : > { %1620 = vmatpush1.bf16.msra.mxu0 %v1619_v62  ;;  %1652 = vmatpush1.bf16.msra.mxu1 %v1651_v63  ;;  %v480_v62 = vld [vmem:[#allocation10 + $0x180] sm:$0xff] }
  0xe5   : > { %1622 = vmatprep.subr.bf16.mxu0 %v1621_v2  ;;  %1654 = vmatprep.subr.bf16.mxu1 %v1653_v3  ;;  %v484_v63 = vld [vmem:[#allocation10 + $0x1a0] sm:$0xff]  ;;  %v482_v2 = vld [vmem:[#allocation10 + $0x190] sm:$0xff] }
  0xe6   : > { %732 = vmatprep.mubr.bf16.mxu0 %v2261_v16  ;;  %785 = vmatprep.mubr.bf16.mxu1 %v2261_v16  ;;  %v466_v16 = vld [vmem:[#allocation10 + $0x110] sm:$0xff]  ;;  %v1643_v8 = vpack.c.bf16 %v484_v63, %v480_v62 }
  0xe7   : > { %v1667_v53 = vpack.c.bf16 %v470_v38, %v466_v16  ;;  %v486_v3 = vld [vmem:[#allocation10 + $0x1b0] sm:$0xff] }
  0xe8   : > { %1624 = vmatpush1.bf16.msra.mxu0 %v1623_v10  ;;  %1656 = vmatpush1.bf16.msra.mxu1 %v1655_v11  ;;  %v1675_v9 = vpack.c.bf16 %v486_v3, %v482_v2  ;;  %v488_v10 = vld [vmem:[#allocation10 + $0x1c0] sm:$0xff]  ;;  %v1645_v11 = vpack.c.bf16 %v493_v5, %v489_v4 }
  0xe9   : > { %1626 = vmatprep.subr.bf16.mxu0 %v1625_v14  ;;  %1658 = vmatprep.subr.bf16.mxu1 %v1657_v15  ;;  %v490_v14 = vld [vmem:[#allocation10 + $0x1d0] sm:$0xff]  ;;  %v1647_v17 = vpack.c.bf16 %v492_v13, %v488_v10 }
  0xea   : > { %v494_v15 = vld [vmem:[#allocation10 + $0x1f0] sm:$0xff] }
  0xeb   : > { %733 = vmatmul.mubr.bf16.gmra.mrb[4].mxu0 %v497_v27  ;;  %786 = vmatmul.mubr.bf16.gmra.mrb[4].mxu1 %v497_v27  ;;  %v1679_v18 = vpack.c.bf16 %v494_v15, %v490_v14  ;;  %v1859_v27 = vld [vmem:[#allocation13 + $0x20] sm:$0xff]  }
  0xec   : > { %1628 = vmatpush1.bf16.msra.mxu0 %v1627_v23  ;;  %1660 = vmatpush1.bf16.msra.mxu1 %v1659_v24  ;;  %v1855_v23 = vld [vmem:[#allocation13] sm:$0xff]   ;;  %v1856_v24 = vld [vmem:[#allocation13 + $0x8] sm:$0xff]  }
  0xed   : > { %1630 = vmatprep.subr.bf16.mxu0 %v1629_v28  ;;  %1662 = vmatprep.subr.bf16.mxu1 %v1661_v29  ;;  %v1860_v28 = vld [vmem:[#allocation13 + $0x28] sm:$0xff]   ;;  %v1861_v29 = vld [vmem:[#allocation13 + $0x30] sm:$0xff]  }
  0xee   : > { %860 = vmatprep.mubr.f32.mxu0 %v2262_v47  ;;  %949 = vmatprep.mubr.f32.mxu1 %v2262_v47 }
  0xf0   : > { %1632 = vmatpush1.bf16.msra.mxu0 %v1631_v39  ;;  %1664 = vmatpush1.bf16.msra.mxu1 %v1663_v40 }
  0xf1   : > { %1634 = vmatprep.subr.bf16.mxu0 %v1633_v45  ;;  %1666 = vmatprep.subr.bf16.mxu1 %v1665_v46 }
  0xf4   : > { %1636 = vmatpush1.bf16.msra.mxu0 %v1635_v52  ;;  %1668 = vmatpush1.bf16.msra.mxu1 %v1667_v53 }
  0xf5   : > { %1638 = vmatprep.subr.bf16.mxu0 %v1637_v55  ;;  %1670 = vmatprep.subr.bf16.mxu1 %v1669_v56 }
  0xf8   : > { %1640 = vmatpush1.bf16.msra.mxu0 %v1639_v60  ;;  %1672 = vmatpush1.bf16.msra.mxu1 %v1671_v61 }
  0xf9   : > { %1642 = vmatprep.subr.bf16.mxu0 %v1641_v0  ;;  %1674 = vmatprep.subr.bf16.mxu1 %v1673_v1 }
  0xfc   : > { %1644 = vmatpush1.bf16.msra.mxu0 %v1643_v8  ;;  %1676 = vmatpush1.bf16.msra.mxu1 %v1675_v9 }
  0xfd   : > { %1646 = vmatprep.subr.bf16.mxu0 %v1645_v11  ;;  %1678 = vmatprep.subr.bf16.mxu1 %v1677_v12 }
 0x100   : > { %1648 = vmatpush1.bf16.msra.mxu0 %v1647_v17  ;;  %1680 = vmatpush1.bf16.msra.mxu1 %v1679_v18 }
 0x101   : > { %1597 = vmatprep.subr.bf16.mxu0 %v1855_v23 }
 0x103   : > { %861 = vmatmul.mubr.f32.vlgmr.msra.gmra.mrb[8].mxu0 %v428_v19  ;;  %950 = vmatmul.mubr.f32.vlgmr.msra.gmra.mrb[8].mxu1 %v428_v19 }
 0x104   : > { %866 = vmatprep.mubr.f32.mxu0 %v2262_v47  ;;  %955 = vmatprep.mubr.f32.mxu1 %v2262_v47 }
 0x105   : > { %1598 = vmatpush3.bf16.msra.mxu0 %v1855_v23 }
 0x106   : > { %1599 = vmatprep.subr.bf16.mxu0 %v1856_v24 }
 0x107   : > { %867 = vmatmul.mubr.f32.gmra.mrb[10].mxu0 %v429_v20  ;;  %956 = vmatmul.mubr.f32.gmra.mrb[10].mxu1 %v429_v20 }
 0x108   : > { %872 = vmatprep.mubr.f32.mxu0 %v2262_v47  ;;  %961 = vmatprep.mubr.f32.mxu1 %v2262_v47 }
 0x109   : > { %1600 = vmatpush3.bf16.msra.mxu0 %v1856_v24 }
 0x10a   : > { %1601 = vmatprep.subr.bf16.mxu0 %v1857_v25 }
 0x10b   : > { %873 = vmatmul.mubr.f32.gmra.mrb[12].mxu0 %v430_v21  ;;  %962 = vmatmul.mubr.f32.gmra.mrb[12].mxu1 %v430_v21 }
 0x10c   : > { %878 = vmatprep.mubr.f32.mxu0 %v2262_v47  ;;  %967 = vmatprep.mubr.f32.mxu1 %v2262_v47 }
 0x10d   : > { %1602 = vmatpush3.bf16.msra.mxu0 %v1857_v25 }
 0x10e   : > { %1603 = vmatprep.subr.bf16.mxu0 %v1858_v26 }
 0x10f   : > { %879 = vmatmul.mubr.f32.gmra.mrb[14].mxu0 %v431_v22  ;;  %968 = vmatmul.mubr.f32.gmra.mrb[14].mxu1 %v431_v22 }
 0x111   : > { %1604 = vmatpush3.bf16.msra.mxu0 %v1858_v26 }
 0x112   : > { %1605 = vmatprep.subr.bf16.mxu0 %v1859_v27 }
 0x115   : > { %1606 = vmatpush3.bf16.msra.mxu0 %v1859_v27 }
 0x116   : > { %1607 = vmatprep.subr.bf16.mxu0 %v1860_v28 }
 0x119   : > { %1608 = vmatpush3.bf16.msra.mxu0 %v1860_v28 }
 0x11a   : > { %1609 = vmatprep.subr.bf16.mxu0 %v1861_v29 }
 0x11d   : > { %1610 = vmatpush3.bf16.msra.mxu0 %v1861_v29 }
 0x11e   : > { %1611 = vmatprep.subr.bf16.mxu0 %v1862_v30 }
 0x121   : > { %1612 = vmatpush3.bf16.msra.mxu0 %v1862_v30 }
 0x1b6   : > { %v724_v31 = vpop.f32.mrb[0].mxu0  ;;  %v777_v32 = vpop.f32.mrb[0].mxu1 }
 0x1b7   : > { %v726_v33 = vpop.f32.mrb[1].mxu0  ;;  %v779_v34 = vpop.f32.mrb[1].mxu1 }
 0x1b8   : > { %v728_v35 = vpop.f32.mrb[2].mxu0  ;;  %v781_v36 = vpop.f32.mrb[2].mxu1 }
 0x1b9   : > { %v730_v37 = vpop.f32.mrb[3].mxu0  ;;  %v783_v16 = vpop.f32.mrb[3].mxu1 }
 0x1be   : > { %v734_v38 = vpop.f32.mrb[4].mxu0  ;;  %v787_v39 = vpop.f32.mrb[4].mxu1 }
 0x1bf   : > { %v736_v40 = vpop.f32.mrb[5].mxu0  ;;  %v789_v41 = vpop.f32.mrb[5].mxu1 }
 0x1c0   : > { %v738_v42 = vpop.f32.mrb[6].mxu0  ;;  %v791_v43 = vpop.f32.mrb[6].mxu1 }
 0x1c1   : > { %v740_v44 = vpop.f32.mrb[7].mxu0  ;;  %v793_v45 = vpop.f32.mrb[7].mxu1 }
 0x1d6   : > { %v862_v46 = vpop.f32.mrb[8].mxu0  ;;  %v951_v48 = vpop.f32.mrb[8].mxu1 }
 0x1d7   : > { %v863_v49 = vadd.f32 %v862_v46, %v724_v31  ;;  %v952_v50 = vadd.f32 %v951_v48, %v777_v32  ;;  %v864_v51 = vpop.f32.mrb[9].mxu0  ;;  %v953_v52 = vpop.f32.mrb[9].mxu1 }
 0x1d8   : > { %v865_v53 = vadd.f32 %v864_v51, %v726_v33  ;;  %v954_v54 = vadd.f32 %v953_v52, %v779_v34 }
 0x1d9   : > { %v1552_v55 = vmul.f32 -1.442695, %v863_v49 }
 0x1da   : > { %v1556_v56 = vmul.f32 -1.442695, %v865_v53  ;;  %v868_v57 = vpop.f32.mrb[10].mxu0  ;;  %v957_v58 = vpop.f32.mrb[10].mxu1  ;;  %v1560_v11 = vmul.f32 -1.442695, %v954_v54 }
 0x1db   : > { %1863 = vpow2.f32 %v1552_v55  ;;  %v869_v59 = vadd.f32 %v868_v57, %v728_v35  ;;  %v958_v60 = vadd.f32 %v957_v58, %v781_v36  ;;  %v870_v61 = vpop.f32.mrb[11].mxu0  ;;  %v959_v62 = vpop.f32.mrb[11].mxu1  ;;  %v425_v53 = vld [vmem:[#allocation18 + $0x8] sm:$0xff] }
 0x1dc   : > { %1865 = vpow2.f32 %v1556_v56  ;;  %v871_v63 = vadd.f32 %v870_v61, %v730_v37  ;;  %v960_v0 = vadd.f32 %v959_v62, %v783_v16 }
 0x1dd   : > { %v1553_v1 = vmul.f32 -1.442695, %v869_v59 }
 0x1de   : > { %v1557_v2 = vmul.f32 -1.442695, %v871_v63  ;;  %v874_v3 = vpop.f32.mrb[12].mxu0  ;;  %v963_v4 = vpop.f32.mrb[12].mxu1  ;;  %v1561_v27 = vmul.f32 -1.442695, %v960_v0 }
 0x1df   : > { %1867 = vpow2.f32 %v1553_v1  ;;  %v875_v5 = vadd.f32 %v874_v3, %v734_v38  ;;  %v964_v6 = vadd.f32 %v963_v4, %v787_v39  ;;  %v876_v7 = vpop.f32.mrb[13].mxu0  ;;  %v965_v8 = vpop.f32.mrb[13].mxu1  ;;  %v426_v63 = vld [vmem:[#allocation18 + $0x10] sm:$0xff] }
 0x1e0   : > { %1869 = vpow2.f32 %v1557_v2  ;;  %v877_v9 = vadd.f32 %v876_v7, %v736_v40  ;;  %v966_v10 = vadd.f32 %v965_v8, %v789_v41 }
 0x1e1   : > { %v1554_v12 = vmul.f32 -1.442695, %v875_v5  ;;  %1871 = vtanh.f32 %v952_v50 }
 0x1e2   : > { %v1558_v13 = vmul.f32 -1.442695, %v877_v9  ;;  %v880_v14 = vpop.f32.mrb[14].mxu0  ;;  %v969_v15 = vpop.f32.mrb[14].mxu1  ;;  %v1562_v33 = vmul.f32 -1.442695, %v966_v10 }
 0x1e3   : > { %1873 = vpow2.f32 %v1554_v12  ;;  %v881_v17 = vadd.f32 %v880_v14, %v738_v42  ;;  %v970_v18 = vadd.f32 %v969_v15, %v791_v43  ;;  %v882_v19 = vpop.f32.mrb[15].mxu0  ;;  %v971_v20 = vpop.f32.mrb[15].mxu1  ;;  %v424_v42 = vld [vmem:[#allocation18] sm:$0xff] }
 0x1e4   : > { %1875 = vpow2.f32 %v1558_v13  ;;  %v883_v21 = vadd.f32 %v882_v19, %v740_v44  ;;  %v972_v22 = vadd.f32 %v971_v20, %v793_v45 }
 0x1e5   : > { %v1864_v23 = vpop.eup %1863  ;;  %1877 = vpow2.f32 %v1560_v11  ;;  %v1555_v24 = vmul.f32 -1.442695, %v881_v17  ;;  %v427_v11 = vld [vmem:[#allocation18 + $0x18] sm:$0xff] }
 0x1e6   : > { %v1866_v25 = vpop.eup %1865  ;;  %v986_v26 = vadd.f32 1.0, %v1864_v23  ;;  %1879 = vtanh.f32 %v958_v60  ;;  %v1559_v29 = vmul.f32 -1.442695, %v883_v21  ;;  %v1563_v43 = vmul.f32 -1.442695, %v972_v22 }
 0x1e7   : > { %v1010_v28 = vadd.f32 1.0, %v1866_v25  ;;  %1881 = vpow2.f32 %v1555_v24 }
 0x1e8   : > { %1883 = vrcp.f32 %v986_v26 }
 0x1e9   : > { %v1868_v30 = vpop.eup %1867  ;;  %1885 = vrcp.f32 %v1010_v28 }
 0x1ea   : > { %v1870_v31 = vpop.eup %1869  ;;  %v987_v32 = vadd.f32 1.0, %v1868_v30  ;;  %1887 = vpow2.f32 %v1561_v27 }
 0x1eb   : > { %v1011_v34 = vadd.f32 1.0, %v1870_v31  ;;  %1889 = vpow2.f32 %v1559_v29  ;;  %v1872_v35 = vpop.eup %1871  ;;  %v1564_v31 = vld [vmem:[%s2747_s6] ss:$0 sm:$0xff] }
 0x1ec   : > { %1891 = vrcp.f32 %v987_v32 }
 0x1ed   : > { %v1874_v36 = vpop.eup %1873  ;;  %1893 = vrcp.f32 %v1011_v34 }
 0x1ee   : > { %v1876_v37 = vpop.eup %1875  ;;  %v988_v16 = vadd.f32 1.0, %v1874_v36  ;;  %1895 = vpow2.f32 %v1562_v33 }
 0x1ef   : > { %v1878_v38 = vpop.eup %1877  ;;  %1897 = vtanh.f32 %v964_v6  ;;  %v1012_v39 = vadd.f32 1.0, %v1876_v37 }
 0x1f0   : > { %v1880_v40 = vpop.eup %1879  ;;  %1899 = vrcp.f32 %v988_v16  ;;  %v1038_v49 = vadd.f32 1.0, %v1878_v38 }
 0x1f1   : > { %v1882_v41 = vpop.eup %1881  ;;  %1901 = vrcp.f32 %v1012_v39  ;;  %v1200_v39 = vlaneseq }
 0x1f2   : > { %v1884_v44 = vpop.eup %1883  ;;  %v989_v45 = vadd.f32 1.0, %v1882_v41  ;;  %1903 = vtanh.f32 %v970_v18 }
 0x1f3   : > { %v1886_v46 = vpop.eup %1885  ;;  %v1054_v48 = vmul.f32 %v1884_v44, %v1872_v35 }
 0x1f4   : > { %v1888_v50 = vpop.eup %1887  ;;  %v1050_v51 = vmul.f32 %v1886_v46, %v424_v42  ;;  %1905 = vrcp.f32 %v989_v45 }
 0x1f5   : > { %v1890_v52 = vpop.eup %1889  ;;  %1907 = vpow2.f32 %v1563_v43  ;;  %v1039_v61 = vadd.f32 1.0, %v1888_v50 }
 0x1f6   : > { %v1892_v54 = vpop.eup %1891  ;;  %v1058_v55 = vadd.f32 %v1054_v48, %v1050_v51  ;;  %v1013_v56 = vadd.f32 1.0, %v1890_v52  ;;  %1909 = vrcp.f32 %v1038_v49 }
 0x1f7   : > { %v1894_v57 = vpop.eup %1893  ;;  %v1055_v58 = vmul.f32 %v1892_v54, %v1880_v40  ;;  %v2571_v40 = vand.u32 127, %v1200_v39 }
 0x1f8   : > { %v1896_v59 = vpop.eup %1895  ;;  %1282 = vst [vmem:[#allocation18] sm:$0xff] %v1058_v55  ;;  %v1051_v60 = vmul.f32 %v1894_v57, %v425_v53  ;;  %1911 = vrcp.f32 %v1013_v56 }
 0x1f9   : > { %v1898_v62 = vpop.eup %1897  ;;  %1913 = vtanh.f32 %v1058_v55  ;;  %v1040_v4 = vadd.f32 1.0, %v1896_v59 }
 0x1fa   : > { %v1900_v0 = vpop.eup %1899  ;;  %v1059_v1 = vadd.f32 %v1055_v58, %v1051_v60  ;;  %1915 = vrcp.f32 %v1039_v61 }
 0x1fb   : > { %v1902_v2 = vpop.eup %1901  ;;  %v1056_v3 = vmul.f32 %v1900_v0, %v1898_v62 }
 0x1fc   : > { %1283 = vst [vmem:[#allocation18 + $0x8] sm:$0xff] %v1059_v1  ;;  %v1052_v5 = vmul.f32 %v1902_v2, %v426_v63  ;;  %v1904_v6 = vpop.eup %1903  ;;  %1917 = vtanh.f32 %v1059_v1 }
 0x1fd   : > { %1919 = vrcp.f32 %v1040_v4 }
 0x1fe   : > { %v1906_v7 = vpop.eup %1905  ;;  %v1060_v8 = vadd.f32 %v1056_v3, %v1052_v5 }
 0x1ff   : > { %v1908_v9 = vpop.eup %1907  ;;  %v1057_v10 = vmul.f32 %v1906_v7, %v1904_v6 }
 0x200   : > { %1921 = vtanh.f32 %v1060_v8  ;;  %1284 = vst [vmem:[#allocation18 + $0x10] sm:$0xff] %v1060_v8  ;;  %v1910_v12 = vpop.eup %1909  ;;  %v1041_v14 = vadd.f32 1.0, %v1908_v9 }
 0x202   : > { %v1912_v13 = vpop.eup %1911  ;;  %1923 = vrcp.f32 %v1041_v14 }
 0x203   : > { %v1914_v15 = vpop.eup %1913  ;;  %v1053_v17 = vmul.f32 %v1912_v13, %v427_v11 }
 0x204   : > { %v1066_v18 = vmul.f32 %v1914_v15, %v1910_v12  ;;  %v1916_v20 = vpop.eup %1915 }
 0x205   : > { %v1061_v19 = vadd.f32 %v1057_v10, %v1053_v17 }
 0x206   : > { %1288 = vst [vmem:[#allocation16] sm:$0xff] %v1066_v18  ;;  %v1918_v21 = vpop.eup %1917 }
 0x207   : > { %1925 = vtanh.f32 %v1061_v19  ;;  %1285 = vst [vmem:[#allocation18 + $0x18] sm:$0xff] %v1061_v19  ;;  %v1067_v22 = vmul.f32 %v1918_v21, %v1916_v20  ;;  %v1920_v23 = vpop.eup %1919 }
 0x209   : > { %v1070_v25 = vpack.c.bf16 %v1067_v22, %v1066_v18  ;;  %1289 = vst [vmem:[#allocation16 + $0x8] sm:$0xff] %v1067_v22 }
 0x20a   : > { %v1922_v24 = vpop.eup %1921 }
 0x20b   : > { %v1068_v26 = vmul.f32 %v1922_v24, %v1920_v23  ;;  %1613 = vmatprep.mubr.bf16.mxu0 %v1070_v25  ;;  %1286 = vst [vmem:[#allocation3] sm:$0xff] %v1070_v25 }
 0x20c   : > { %v1924_v27 = vpop.eup %1923 }
 0x20d   : > { %1290 = vst [vmem:[#allocation16 + $0x10] sm:$0xff] %v1068_v26 }
 0x211   : > { %v1926_v28 = vpop.eup %1925 }
 0x212   : > { %v1069_v29 = vmul.f32 %v1926_v28, %v1924_v27 }
 0x214   : > { %v1071_v30 = vpack.c.bf16 %v1069_v29, %v1068_v26  ;;  %1291 = vst [vmem:[#allocation16 + $0x18] sm:$0xff] %v1069_v29 }
 0x216   : > { %1614 = vmatmul.mubr.bf16.vlgmr.msra.gmra.mrb[16].mxu0 %v1071_v30  ;;  %1287 = vst [vmem:[#allocation3 + $0x8] sm:$0xff] %v1071_v30 }
 0x2e9   : > { %v1615_v32 = vpop.f32.mrb[16].mxu0 }
 0x2ea   : > { %v2559_v33 = vadd.f32 %v1615_v32, %v1564_v31  ;;  %v1177_v34 = vpop.f32.mrb[17].mxu0 }
 0x2eb   : > { %v2561_v35 = vadd.f32 %v1564_v31, %v1177_v34  ;;  %v1616_v36 = vpop.f32.mrb[18].mxu0 }
 0x2ec   : > { %1196 = vmax.xlane.f32.xlu1 %v2559_v33  ;;  %v1180_v37 = vpop.f32.mrb[19].mxu0  ;;  %v2565_v16 = vadd.f32 %v1616_v36, %v1564_v31 }
 0x2ed   : > { %1192 = vmax.xlane.f32.xlu0 %v2561_v35  ;;  %v2567_v38 = vadd.f32 %v1564_v31, %v1180_v37 }
 0x2f0   : > { %1198 = vmax.xlane.f32.xlu1 %v2565_v16 }
 0x2f1   : > { %1194 = vmax.xlane.f32.xlu0 %v2567_v38 }
 0x379   : > { %v2573_v41 = vpop.xlane.xlu1 %1196 }
 0x37a   : > { %vm1204_vm0 = vcmp.eq.f32.partialorder %v2559_v33, %v2573_v41  ;;  %v1294_v42 = vsub.f32 %v2559_v33, %v2573_v41  ;;  %v2579_v43 = vpop.xlane.xlu0 %1192 }
 0x37b   : > { %vm1202_vm1 = vcmp.eq.f32.partialorder %v2561_v35, %v2579_v43  ;;  %v1292_v44 = vsub.f32 %v2561_v35, %v2579_v43  ;;  %v1208_v45 = vsel %vm1204_vm0, %v2571_v40, 128 }
 0x37c   : > { %v1206_v46 = vsel %vm1202_vm1, %v2571_v40, 128  ;;  %v1300_v51 = vmul.f32 1.442695, %v1294_v42  ;;  %v1239_v54 = vshra.s32 %v1208_v45, 16  ;;  %v1238_v10 = vand.u32 65535, %v1208_v45 }
 0x37d   : > { %v1296_v48 = vmul.f32 1.442695, %v1292_v44  ;;  %v2587_v49 = vpop.xlane.xlu1 %1198  ;;  %v1211_v50 = vshra.s32 %v1206_v46, 16  ;;  %v1210_v6 = vand.u32 65535, %v1206_v46 }
 0x37e   : > { %vm1205_vm2 = vcmp.eq.f32.partialorder %v2565_v16, %v2587_v49  ;;  %v1295_v52 = vsub.f32 %v2565_v16, %v2587_v49  ;;  %v2593_v53 = vpop.xlane.xlu0 %1194  ;;  %v1241_v61 = vcvt.s32.f32 %v1239_v54  ;;  %v1240_v15 = vcvt.s32.f32 %v1238_v10 }
 0x37f   : > { %1927 = vpow2.f32 %v1296_v48  ;;  %vm1203_vm3 = vcmp.eq.f32.partialorder %v2567_v38, %v2593_v53  ;;  %v1293_v55 = vsub.f32 %v2567_v38, %v2593_v53  ;;  %v1213_v56 = vcvt.s32.f32 %v1211_v50 }
 0x380   : > { %v1207_v57 = vsel %vm1203_vm3, %v2571_v40, 128  ;;  %v1209_v58 = vsel %vm1205_vm2, %v2571_v40, 128  ;;  %1929 = vpow2.f32 %v1300_v51  ;;  %v1302_v62 = vmul.f32 1.442695, %v1295_v52 }
 0x381   : > { %v1298_v59 = vmul.f32 1.442695, %v1293_v55  ;;  %1214 = vmin.xlane.f32.xlu0 %v1213_v56  ;;  %v1225_v60 = vshra.s32 %v1207_v57, 16  ;;  %v1253_v0 = vshra.s32 %v1209_v58, 16  ;;  %v1212_v8 = vcvt.s32.f32 %v1210_v6 }
 0x382   : > { %v1224_v9 = vand.u32 65535, %v1207_v57  ;;  %v1252_v17 = vand.u32 65535, %v1209_v58 }
 0x383   : > { %1931 = vpow2.f32 %v1298_v59  ;;  %v1227_v63 = vcvt.s32.f32 %v1225_v60  ;;  %v1255_v1 = vcvt.s32.f32 %v1253_v0 }
 0x384   : > { %1933 = vpow2.f32 %v1302_v62  ;;  %v1226_v14 = vcvt.s32.f32 %v1224_v9  ;;  %v1254_v21 = vcvt.s32.f32 %v1252_v17 }
 0x385   : > { %1242 = vmin.xlane.f32.xlu0 %v1241_v61  ;;  %1228 = vmin.xlane.f32.xlu1 %v1227_v63 }
 0x389   : > { %v1928_v2 = vpop.eup %1927  ;;  %1256 = vmin.xlane.f32.xlu1 %v1255_v1 }
 0x38a   : > { %1304 = vadd.xlane.f32.xlu0 %v1928_v2  ;;  %v1930_v3 = vpop.eup %1929 }
 0x38d   : > { %v1932_v4 = vpop.eup %1931 }
 0x38e   : > { %1308 = vadd.xlane.f32.xlu0 %v1930_v3  ;;  %1306 = vadd.xlane.f32.xlu1 %v1932_v4  ;;  %v1934_v5 = vpop.eup %1933 }
 0x392   : > { %1310 = vadd.xlane.f32.xlu1 %v1934_v5 }
 0x40e   : > { %v2601_v7 = vpop.xlane.xlu0 %1214 }
 0x40f   : > { %vm1216_vm4 = vcmp.eq.f32.partialorder %v1213_v56, %v2601_v7 }
 0x410   : > { %v1217_v11 = vsel %vm1216_vm4, %v1212_v8, inf }
 0x411   : > { %1218 = vmin.xlane.f32.xlu0 %v1217_v11 }
 0x412   : > { %v2604_v12 = vpop.xlane.xlu1 %1228  ;;  %v2606_v13 = vpop.xlane.xlu0 %1242 }
 0x413   : > { %vm1230_vm5 = vcmp.eq.f32.partialorder %v1227_v63, %v2604_v12  ;;  %vm1244_vm6 = vcmp.eq.f32.partialorder %v1241_v61, %v2606_v13 }
 0x414   : > { %v1231_v18 = vsel %vm1230_vm5, %v1226_v14, inf  ;;  %v1245_v19 = vsel %vm1244_vm6, %v1240_v15, inf }
 0x415   : > { %1232 = vmin.xlane.f32.xlu1 %v1231_v18  ;;  %1246 = vmin.xlane.f32.xlu0 %v1245_v19 }
 0x416   : > { %v2610_v20 = vpop.xlane.xlu1 %1256 }
 0x417   : > { %v1305_v22 = vpop.xlane.xlu0 %1304  ;;  %vm1258_vm7 = vcmp.eq.f32.partialorder %v1255_v1, %v2610_v20 }
 0x418   : > { %1935 = vlog2.f32 %v1305_v22  ;;  %v1259_v23 = vsel %vm1258_vm7, %v1254_v21, inf }
 0x419   : > { %1260 = vmin.xlane.f32.xlu1 %v1259_v23 }
 0x41b   : > { %v1307_v24 = vpop.xlane.xlu1 %1306  ;;  %v1309_v25 = vpop.xlane.xlu0 %1308 }
 0x41c   : > { %1937 = vlog2.f32 %v1307_v24 }
 0x41d   : > { %1939 = vlog2.f32 %v1309_v25 }
 0x41f   : > { %v1311_v26 = vpop.xlane.xlu1 %1310 }
 0x420   : > { %1941 = vlog2.f32 %v1311_v26 }
 0x422   : > { %v1936_v27 = vpop.eup %1935 }
 0x423   : > { %v1313_v28 = vmul.f32 0.6931472, %v1936_v27 }
 0x425   : > { %v1320_v29 = vadd.f32 %v1313_v28, %v2579_v43 }
 0x426   : > { %v1938_v30 = vpop.eup %1937 }
 0x427   : > { %v1940_v31 = vpop.eup %1939  ;;  %v1324_v32 = vsub.f32 %v2561_v35, %v1320_v29  ;;  %v1315_v34 = vmul.f32 0.6931472, %v1938_v30 }
 0x428   : > { %v1317_v36 = vmul.f32 0.6931472, %v1940_v31 }
 0x429   : > { %1328 = vst [vmem:[%s2540_s17] sm:$0xff] %v1324_v32  ;;  %v1321_v37 = vadd.f32 %v1315_v34, %v2593_v53 }
 0x42a   : > { %v1942_v39 = vpop.eup %1941  ;;  %v1322_v42 = vadd.f32 %v1317_v36, %v2573_v41 }
 0x42b   : > { %v1325_v44 = vsub.f32 %v2567_v38, %v1321_v37  ;;  %v1319_v45 = vmul.f32 0.6931472, %v1942_v39 }
 0x42c   : > { %v1326_v43 = vsub.f32 %v2559_v33, %v1322_v42 }
 0x42d   : > { %1329 = vst [vmem:[%s2540_s17 + $0x8] sm:$0xff] %v1325_v44  ;;  %v1323_v46 = vadd.f32 %v1319_v45, %v2587_v49 }
 0x42e   : > { %1330 = vst [vmem:[%s2540_s17 + $0x10] sm:$0xff] %v1326_v43 }
 0x42f   : > { %v1327_v35 = vsub.f32 %v2565_v16, %v1323_v46 }
 0x431   : > { %1331 = vst [vmem:[%s2540_s17 + $0x18] sm:$0xff] %v1327_v35 }
 0x432   : > { %2124 = shalt.err (!%p2121_p6)
}
 0x433   : > { %s2125_s14 = scalar_lea.hbm %s2749_s8, 512  ;;  %p2787_p10 = pmov %p2786_p7 }
 0x434   : > { %p2126_p9 = scmp.ne.s32.totalorder %s2749_s8, %s2125_s14  ;;  %p2131_p0 = scmp.lt.u32.totalorder %s2125_s14, %s2749_s8 }
 0x436   : > { %p2127_p13 = pnand %p2126_p9, %p2787_p10 }
 0x438   : > { %p2128_p11 = pneg %p2127_p13 }
 0x43a   : > { %p2133_p3 = pnand %p2131_p0, %p2128_p11 }
 0x43c   : > { %2136 = shalt.err (!%p2133_p3)
}
 0x43d   : > { %s2264_s29 = smov 128   ;;  %s2265_s22 = smov 8  }
 0x43e   : > { %p2788_p4 = pmov %p2786_p7  ;;  %s1346_s26 = sshll.u32 %s2540_s17, 4  ;;  %s2653_s26 = int_to_ptr.vmem [resolvable:$true] %s1346_s26 }
 0x43f   : > { %s2266_s25 = smov [#allocation18]   ;;  %s2659_s1 = scalar_lea.sflag [#allocation6], %s388_s21 }
 0x440   : > { %1707 = dma.vmem_to_hbm [thread:$0]  (%p2788_p4), %s1360_s27, 512, %s2749_s8, [#allocation17], %s2264_s29, %s2264_s29, %s2265_s22  }
 0x441   : > { %s2655_s20 = sshll.u32 %s2266_s25, 4  ;;  %s2137_s14 = scalar_lea.vmem %s2653_s26, 512  ;;  %s1373_s20 = int_to_ptr.vmem [resolvable:$true] %s2655_s20 }
 0x442   : > { %p2138_p7 = scmp.ne.s32.totalorder %s2653_s26, %s2137_s14  ;;  %p2789_p8 = scmp.ne.s32.totalorder %s2767_s19, 0 }
 0x443   : > { %s2267_s11 = smov [#allocation15]  }
 0x444   : > { %p2139_p12 = pnand %p2138_p7, %p2789_p8  ;;  %s2141_s15 = sshll.u32 %s2267_s11, 4  ;;  %s2142_s15 = int_to_ptr.vmem [resolvable:$false] %s2141_s15 }
 0x445   : > { %s2143_s17 = scalar_lea.vmem %s2142_s15, 1024  ;;  %p2144_p5 = scmp.lt.s32.totalorder %s2653_s26, %s2142_s15 }
 0x446   : > { %p2140_p2 = pneg %p2139_p12  ;;  %p2145_p1 = scmp.lt.s32.totalorder %s2143_s17, %s2137_s14 }
 0x448   : > { %p2146_p6 = por %p2145_p1, %p2144_p5 }
 0x44a   : > { %p2147_p9 = pnand %p2146_p6, %p2140_p2 }
 0x44c   : > { %2150 = shalt.err (!%p2147_p9)
}
 0x44d   : > { %s2151_s21 = scalar_lea.hbm %s2628_s16, 512  ;;  %s2155_s28 = scalar_lea.hbm %s2748_s7, 4096 }
 0x44e   : > { %p2152_p10 = scmp.ne.s32.totalorder %s2628_s16, %s2151_s21  ;;  %p2156_p0 = scmp.lt.u32.totalorder %s2628_s16, %s2748_s7 }
 0x44f   : > { %p2157_p3 = scmp.lt.u32.totalorder %s2155_s28, %s2151_s21  ;;  %p2159_p7 = scmp.lt.u32.totalorder %s2151_s21, %s2628_s16 }
 0x450   : > { %p2153_p13 = pnand %p2152_p10, %p2789_p8 }
 0x451   : > { %p2158_p4 = por %p2157_p3, %p2156_p0 }
 0x452   : > { %p2154_p11 = pneg %p2153_p13 }
 0x453   : > { %p2160_p12 = por %p2159_p7, %p2158_p4 }
 0x455   : > { %p2161_p2 = pnand %p2160_p12, %p2154_p11 }
 0x457   : > { %2164 = shalt.err (!%p2161_p2)
}
 0x458   : > { %1705 = dma.vmem_to_hbm [thread:$0]  (%p2789_p8), %s2653_s26, 512, %s2628_s16, %s2659_s1, %s2264_s29, %s2264_s29, %s2265_s22  }
 0x459   : > { %s2165_s25 = scalar_lea.vmem %s1373_s20, 512  ;;  %p2790_p1 = scmp.eq.s32.totalorder %s2339_s13, 7 }
 0x45a   : > { %p2166_p5 = scmp.ne.s32.totalorder %s1373_s20, %s2165_s25  ;;  %p2172_p10 = scmp.lt.s32.totalorder %s1373_s20, %s1373_s20 }
 0x45b   : > { %p2173_p13 = scmp.lt.s32.totalorder %s2165_s25, %s2165_s25 }
 0x45c   : > { %p2167_p6 = pnand %p2166_p5, %p2790_p1 }
 0x45d   : > { %p2174_p11 = por %p2173_p13, %p2172_p10 }
 0x45e   : > { %p2168_p9 = pneg %p2167_p6 }
 0x460   : > { %p2175_p0 = pnand %p2174_p11, %p2168_p9 }
 0x462   : > { %2178 = shalt.err (!%p2175_p0)
}
 0x463   : > { %s2179_s11 = scalar_lea.hbm %s2750_s9, 512  ;;  %p2791_p3 = pmov %p2790_p1 }
 0x464   : > { %p2180_p8 = scmp.ne.s32.totalorder %s2750_s9, %s2179_s11  ;;  %p2185_p12 = scmp.lt.u32.totalorder %s2179_s11, %s2750_s9 }
 0x466   : > { %p2181_p4 = pnand %p2180_p8, %p2791_p3 }
 0x468   : > { %p2182_p7 = pneg %p2181_p4 }
 0x46a   : > { %p2187_p2 = pnand %p2185_p12, %p2182_p7 }
 0x46c   : > { %2190 = shalt.err (!%p2187_p2)
}
 0x46d   : > { %p2792_p5 = pmov %p2790_p1  ;;  %v1221_v33 = vcvt.f32.s32 %v2601_v7  ;;  %v1235_v16 = vcvt.f32.s32 %v2604_v12  ;;  %v1249_v38 = vcvt.f32.s32 %v2606_v13  ;;  %v1263_v55 = vcvt.f32.s32 %v2610_v20 }
 0x46f   : > { %1709 = dma.vmem_to_hbm [thread:$0]  (%p2792_p5), %s1373_s20, 512, %s2750_s9, [#allocation17], %s2264_s29, %s2264_s29, %s2265_s22   ;;  %v1222_v48 = vshll.u32 %v1221_v33, 16  ;;  %v1236_v51 = vshll.u32 %v1235_v16, 16  ;;  %v1250_v52 = vshll.u32 %v1249_v38, 16  ;;  %v1264_v62 = vshll.u32 %v1263_v55, 16 }
 0x49e   : > { %v1219_v41 = vpop.xlane.xlu0 %1218 }
 0x49f   : > { %v1220_v49 = vcvt.f32.s32 %v1219_v41 }
 0x4a1   : > { %v1223_v50 = vadd.s32 %v1222_v48, %v1220_v49 }
 0x4a2   : > { %v1233_v53 = vpop.xlane.xlu1 %1232  ;;  %v1247_v54 = vpop.xlane.xlu0 %1246 }
 0x4a3   : > { %vm1266_vm8 = vcmp.eq.s32.totalorder %v2571_v40, %v1223_v50  ;;  %v1234_v56 = vcvt.f32.s32 %v1233_v53  ;;  %v1248_v57 = vcvt.f32.s32 %v1247_v54 }
 0x4a4   : > { %v1573_v58 = vsel %vm1266_vm8, 1.0, %v2262_v47 }
 0x4a5   : > { %1278 = vst [vmem:[#allocation2] sm:$0xff] %v1573_v58  ;;  %v1237_v59 = vadd.s32 %v1236_v51, %v1234_v56  ;;  %v1251_v60 = vadd.s32 %v1250_v52, %v1248_v57 }
 0x4a6   : > { %v1261_v61 = vpop.xlane.xlu1 %1260 }
 0x4a7   : > { %vm1267_vm9 = vcmp.eq.s32.totalorder %v2571_v40, %v1237_v59  ;;  %vm1268_vm10 = vcmp.eq.s32.totalorder %v2571_v40, %v1251_v60  ;;  %v1262_v63 = vcvt.f32.s32 %v1261_v61 }
 0x4a8   : > { %v1574_v0 = vsel %vm1267_vm9, 1.0, %v2262_v47  ;;  %v1575_v1 = vsel %vm1268_vm10, 1.0, %v2262_v47 }
 0x4a9   : > { %1279 = vst [vmem:[#allocation2 + $0x8] sm:$0xff] %v1574_v0  ;;  %1280 = vst [vmem:[#allocation2 + $0x10] sm:$0xff] %v1575_v1  ;;  %v1265_v2 = vadd.s32 %v1264_v62, %v1262_v63 }
 0x4ab   : > { %vm1269_vm11 = vcmp.eq.s32.totalorder %v2571_v40, %v1265_v2 }
 0x4ac   : > { %v1576_v3 = vsel %vm1269_vm11, 1.0, %v2262_v47 }
 0x4ad   : > { %1281 = vst [vmem:[#allocation2 + $0x18] sm:$0xff] %v1576_v3 }
 0x4ae   : > { %2224 = dma.done.wait (%p2790_p1), [#allocation17], 1024   ;;  %p2793_p6 = pmov %p2790_p1 }
 0x4b0   : > { %2226 = vsyncadd (%p2793_p6), [#allocation17], 4294966272 }
 0x4b1 PF: > { %s2794_s29 = sld [smem:[#allocation28_spill]]  ;;  %p1754_p9 = scmp.ge.s32.totalorder %s2245_s12, 2 }
 0x4b2   : > { %s1395_s22 = sand.u32 1, %s2233_s30  }
 0x4b3   : > { %s1396_s20 = scalar_lea.sflag [#allocation6], %s1395_s22 }
 0x4b7   : > { %p2795_p10 = scmp.ne.s32.totalorder %s2794_s29, 0 }
 0x4b9   : > { %p1735_p13 = pnand %p1754_p9, %p2795_p10 }
 0x4bb   : > { %2228 = dma.done.wait (!%p1735_p13), %s1396_s20, 512  }
 0x4bc   : > { %2230 = vsyncadd (!%p1735_p13), %s1396_s20, 4294966784  ;;  %s2796_s12 = sld [smem:[#allocation26_spill]]  ;;  %s2797_s27 = sld [smem:[#allocation25_spill]] }
 0x4bd   : > { %s2798_s11 = sld [smem:[#allocation27_spill]]  ;;  %s2799_s30 = smov %s2237_s10 }
 0x4c2   : > { %p25_p11 = scmp.ge.s32.totalorder %s2796_s12, 10   ;;  %s2800_s10 = smov %s2797_s27 }
 0x4c4   :  { %27 = sbr.rel (!%p25_p11) target bundleno = 10 (0xa), region = 125 }
 0x4cb   :  { %1401 = vsyncpa [#allocation5], 1 }
 0x4cc   :  { %1403 = vsyncpa [#allocation5 + $0x1], 1 }
 0x4cd   :  { %1404 = vsyncpa [#allocation8], 1 }
 0x4ce   :  { %1405 = vsyncpa [#allocation11], 1 }
 0x4cf   :  { %1406 = vsyncpa [#allocation14], 1 }
 0x4d0   :  { %1407 = vsyncpa [#allocation6], 1 }
 0x4d1   :  { %1409 = vsyncpa [#allocation6 + $0x1], 1 }
 0x4d2   :  { %1410 = vsyncpa [#allocation17], 1 }

</bundles_post_ra>
